<compile_context>
chip_gen: v7x
topology: tpu7x:2x2x1
jax: 0.10.0
libtpu: 0.0.40
codegen_flags: <defaults>
</compile_context>

<pallas_src>
import jax
import jax.numpy as jnp
from jax import lax
from jax.experimental import pallas as pl
from jax.experimental.pallas import tpu as pltpu


def lstm_attn_kernel(emb_ref,    # (1, T, E)  f32 — one example (batch tile) per grid step
                     w_ih_ref,   # (E, 4H)    f32  (PyTorch W_ih^T, gate order i,f,g,o)
                     w_hh_ref,   # (H, 4H)    f32  (PyTorch W_hh^T)
                     b_ref,      # (1, 4H)    f32  (b_ih + b_hh)
                     v_ref,      # (1, H)     f32  attention vector
                     fc_w_ref,   # (H, O)     f32  (fc.weight^T)
                     fc_b_ref,   # (1, O)     f32
                     out_ref):   # (1, 1, O)  f32
    _, T, E = emb_ref.shape
    H = w_hh_ref.shape[0]
    H4 = 4 * H

    # ---- hoist loop-invariant weight loads (no per-step vld re-issue)
    w_ih = w_ih_ref[...]
    w_hh = w_hh_ref[...]
    bias = b_ref[...]
    v = v_ref[...]

    # ---- input projection for ALL timesteps: ONE MXU matmul, off the serial path
    x = emb_ref[0]                                                     # (T, E)
    gx = jnp.dot(x, w_ih, preferred_element_type=jnp.float32) + bias   # (T, 4H)

    # lane mask selecting the g-gate block [2H, 3H) of the 4H-wide gate vector
    lane = lax.broadcasted_iota(jnp.int32, (1, H4), 1)
    g_mask = (lane >= 2 * H) & (lane < 3 * H)

    h = jnp.zeros((1, H), jnp.float32)   # PyTorch LSTM zero initial state
    c = jnp.zeros((1, H), jnp.float32)
    h_seq = []
    score_seq = []

    # T is small & static: a Python loop IS the full unroll
    # (== lax.fori_loop(..., unroll=True)); the scheduler sees across timesteps.
    for t in range(T):
        # only this (1,H)x(H,4H) matmul remains on the serial critical path
        gates = gx[t:t + 1, :] + jnp.dot(h, w_hh,
                                         preferred_element_type=jnp.float32)  # (1, 4H)
        # full-lane activations: one sigmoid + one tanh over the whole 128-lane vreg
        act = jnp.where(g_mask, jnp.tanh(gates), jax.nn.sigmoid(gates))
        i_g = act[:, 0:H]
        f_g = act[:, H:2 * H]
        g_g = act[:, 2 * H:3 * H]
        o_g = act[:, 3 * H:4 * H]
        c = f_g * c + i_g * g_g
        h = o_g * jnp.tanh(c)
        h_seq.append(h)
        # fused attention score: rides on EUP/XLU slots under the serial matmul
        score_seq.append(jnp.sum(jnp.tanh(h) * v, axis=-1, keepdims=True))     # (1, 1)

    # ---- softmax over time, kept entirely in registers (no (T,B,H) re-read)
    m = score_seq[0]
    for s in score_seq[1:]:
        m = jnp.maximum(m, s)
    e_seq = [jnp.exp(s - m) for s in score_seq]
    denom = e_seq[0]
    for e in e_seq[1:]:
        denom = denom + e
    inv = 1.0 / denom   # exact; pl.reciprocal(..., approx=True) would relax accuracy

    # weighted sum over time of the RAW LSTM outputs (matches torch.mul + sum(dim=1))
    ctx = h_seq[0] * (e_seq[0] * inv)
    for t in range(1, T):
        ctx = ctx + h_seq[t] * (e_seq[t] * inv)

    # ---- tanh + final linear (O=4 => masked store; fine at this size)
    fc_w = fc_w_ref[...]
    fc_b = fc_b_ref[...]
    out = jnp.dot(jnp.tanh(ctx), fc_w, preferred_element_type=jnp.float32) + fc_b  # (1, O)
    out_ref[0] = out


def _full_spec(a):
    zeros = (0,) * a.ndim
    return pl.BlockSpec(a.shape, lambda bi: zeros)


def lstm_attention_classifier(x_ids, params):
    """x_ids: (B, T) int32 token ids. Returns (B, output_size) float32."""
    emb_table = params["embedding"]                          # (V, E)
    w_ih = params["w_ih"]                                    # (E, 4H)
    w_hh = params["w_hh"]                                    # (H, 4H)
    b = params["b"]                                          # (1, 4H)
    v = params["v"]                                          # (1, H)
    fc_w = params["fc_w"]                                    # (H, O)
    fc_b = params["fc_b"]                                    # (1, O)

    B, T = x_ids.shape
    E = emb_table.shape[1]
    O = fc_w.shape[1]

    # glue: embedding gather directly in the (B, T, E) layout the kernel consumes
    # (no separate transpose pass through HBM).
    embedded = jnp.take(emb_table, x_ids, axis=0).astype(jnp.float32)   # (B, T, E)

    out = pl.pallas_call(
        lstm_attn_kernel,
        out_shape=jax.ShapeDtypeStruct((B, 1, O), jnp.float32),
        grid=(B,),   # one example per step; "parallel" => v7x's 2 TCs split the batch
        in_specs=[
            pl.BlockSpec((1, T, E), lambda bi: (bi, 0, 0)),
            _full_spec(w_ih),
            _full_spec(w_hh),
            _full_spec(b),
            _full_spec(v),
            _full_spec(fc_w),
            _full_spec(fc_b),
        ],
        out_specs=pl.BlockSpec((1, 1, O), lambda bi: (bi, 0, 0)),
        compiler_params=pltpu.CompilerParams(
            dimension_semantics=("parallel",),
        ),
    )(embedded, w_ih, w_hh, b, v, fc_w, fc_b)
    return out[:, 0, :]


def reference_jax(x_ids, params):
    """Pure-JAX reference mirroring the PyTorch forward."""
    emb = jnp.take(params["embedding"], x_ids, axis=0)       # (B, T, E)
    H = params["w_hh"].shape[0]
    B = x_ids.shape[0]

    def step(carry, x_t):
        h, c = carry
        gates = x_t @ params["w_ih"] + h @ params["w_hh"] + params["b"][0]
        i_g = jax.nn.sigmoid(gates[:, 0:H])
        f_g = jax.nn.sigmoid(gates[:, H:2 * H])
        g_g = jnp.tanh(gates[:, 2 * H:3 * H])
        o_g = jax.nn.sigmoid(gates[:, 3 * H:4 * H])
        c_new = f_g * c + i_g * g_g
        h_new = o_g * jnp.tanh(c_new)
        return (h_new, c_new), h_new

    init = (jnp.zeros((B, H), jnp.float32), jnp.zeros((B, H), jnp.float32))
    _, outs = lax.scan(step, init, jnp.transpose(emb, (1, 0, 2)))   # (T, B, H)
    scores = jnp.einsum("tbh,h->tb", jnp.tanh(outs), params["v"][0])
    attn = jax.nn.softmax(scores, axis=0)
    ctx = jnp.einsum("tbh,tb->bh", outs, attn)
    return jnp.tanh(ctx) @ params["fc_w"] + params["fc_b"][0]


def init_params(key, vocab_size, embedding_size, hidden_size, output_size):
    ks = jax.random.split(key, 7)
    s = 0.1
    return {
        "embedding": jax.random.normal(ks[0], (vocab_size, embedding_size), jnp.float32),
        "w_ih": s * jax.random.normal(ks[1], (embedding_size, 4 * hidden_size), jnp.float32),
        "w_hh": s * jax.random.normal(ks[2], (hidden_size, 4 * hidden_size), jnp.float32),
        "b":    s * jax.random.normal(ks[3], (1, 4 * hidden_size), jnp.float32),
        "v":    jax.random.normal(ks[4], (1, hidden_size), jnp.float32),
        "fc_w": s * jax.random.normal(ks[5], (hidden_size, output_size), jnp.float32),
        "fc_b": s * jax.random.normal(ks[6], (1, output_size), jnp.float32),
    }


if __name__ == "__main__":
    vocab_size, embedding_size, hidden_size, output_size = 50, 16, 32, 4
    B, T = 2, 8

    key = jax.random.PRNGKey(0)
    k_param, k_ids = jax.random.split(key)
    params = init_params(k_param, vocab_size, embedding_size, hidden_size, output_size)
    x_ids = jax.random.randint(k_ids, (B, T), 0, vocab_size, dtype=jnp.int32)

    out = jax.block_until_ready(lstm_attention_classifier(x_ids, params))
    ref = jax.block_until_ready(reference_jax(x_ids, params))

    assert out.shape == (B, output_size)
    assert jnp.allclose(out, ref, atol=1e-4, rtol=1e-4), (out, ref)
    print("KERNEL_OK")
</pallas_src>

<mosaic_0001>
module attributes {stable_mosaic.version = 11 : i64} {
  func.func @lstm_attn_kernel(%arg0: i32, %arg1: memref<1x8x16xf32, #tpu.memory_space<vmem>>, %arg2: memref<16x128xf32, #tpu.memory_space<vmem>>, %arg3: memref<32x128xf32, #tpu.memory_space<vmem>>, %arg4: memref<1x128xf32, #tpu.memory_space<vmem>>, %arg5: memref<1x32xf32, #tpu.memory_space<vmem>>, %arg6: memref<32x4xf32, #tpu.memory_space<vmem>>, %arg7: memref<1x4xf32, #tpu.memory_space<vmem>>, %arg8: memref<1x1x4xf32, #tpu.memory_space<vmem>>) attributes {dimension_semantics = [#tpu.dimension_semantics<parallel>], iteration_bounds = array<i64: 2>, scalar_prefetch = 0 : i64, scratch_operands = 0 : i64, tpu.core_type = #tpu.core_type<tc>, window_params = [{transform_indices = @transform_0, window_bounds = array<i64: 1, 8, 16>}, {pipeline_mode = #tpu.pipeline_mode<synchronous>, transform_indices = @transform_1, window_bounds = array<i64: 16, 128>}, {pipeline_mode = #tpu.pipeline_mode<synchronous>, transform_indices = @transform_2, window_bounds = array<i64: 32, 128>}, {pipeline_mode = #tpu.pipeline_mode<synchronous>, transform_indices = @transform_3, window_bounds = array<i64: 1, 128>}, {pipeline_mode = #tpu.pipeline_mode<synchronous>, transform_indices = @transform_4, window_bounds = array<i64: 1, 32>}, {pipeline_mode = #tpu.pipeline_mode<synchronous>, transform_indices = @transform_5, window_bounds = array<i64: 32, 4>}, {pipeline_mode = #tpu.pipeline_mode<synchronous>, transform_indices = @transform_6, window_bounds = array<i64: 1, 4>}, {transform_indices = @transform_7, window_bounds = array<i64: 1, 1, 4>}]} {
    %c0 = arith.constant 0 : index
    %c0_0 = arith.constant 0 : index
    %0 = vector.load %arg2[%c0, %c0_0] : memref<16x128xf32, #tpu.memory_space<vmem>>, vector<16x128xf32>
    %c0_1 = arith.constant 0 : index
    %c0_2 = arith.constant 0 : index
    %1 = vector.load %arg3[%c0_1, %c0_2] : memref<32x128xf32, #tpu.memory_space<vmem>>, vector<32x128xf32>
    %c0_3 = arith.constant 0 : index
    %c0_4 = arith.constant 0 : index
    %2 = vector.load %arg4[%c0_3, %c0_4] : memref<1x128xf32, #tpu.memory_space<vmem>>, vector<1x128xf32>
    %c0_5 = arith.constant 0 : index
    %c0_6 = arith.constant 0 : index
    %3 = vector.load %arg5[%c0_5, %c0_6] : memref<1x32xf32, #tpu.memory_space<vmem>>, vector<1x32xf32>
    %c0_7 = arith.constant 0 : index
    %c0_8 = arith.constant 0 : index
    %c0_9 = arith.constant 0 : index
    %4 = vector.load %arg1[%c0_7, %c0_8, %c0_9] : memref<1x8x16xf32, #tpu.memory_space<vmem>>, vector<1x8x16xf32>
    %5 = vector.shape_cast %4 : vector<1x8x16xf32> to vector<8x16xf32>
    %cst = arith.constant dense<0.000000e+00> : vector<8x128xf32>
    %6 = tpu.matmul %5, %0, %cst {dimension_numbers = #tpu.dot_dimension_numbers<[1], [0], [0], [1], [0, 0, 1, 1], [], []>} : vector<8x16xf32>, vector<16x128xf32>, vector<8x128xf32> -> vector<8x128xf32>
    %7 = vector.broadcast %2 : vector<1x128xf32> to vector<8x128xf32>
    %8 = arith.addf %6, %7 : vector<8x128xf32>
    %9 = tpu.iota {dimensions = array<i32: 1>} : vector<1x128xi32>
    %c64_i32 = arith.constant 64 : i32
    %10 = vector.broadcast %c64_i32 : i32 to vector<1x128xi32>
    %11 = arith.cmpi sge, %9, %10 : vector<1x128xi32>
    %c96_i32 = arith.constant 96 : i32
    %12 = vector.broadcast %c96_i32 : i32 to vector<1x128xi32>
    %13 = arith.cmpi slt, %9, %12 : vector<1x128xi32>
    %14 = arith.andi %11, %13 : vector<1x128xi1>
    %cst_10 = arith.constant 0.000000e+00 : f32
    %15 = vector.broadcast %cst_10 : f32 to vector<1x32xf32>
    %cst_11 = arith.constant 0.000000e+00 : f32
    %16 = vector.broadcast %cst_11 : f32 to vector<1x32xf32>
    %17 = vector.extract_strided_slice %8 {offsets = [0, 0], sizes = [1, 128], strides = [1, 1]} : vector<8x128xf32> to vector<1x128xf32>
    %cst_12 = arith.constant dense<0.000000e+00> : vector<1x128xf32>
    %18 = tpu.matmul %15, %1, %cst_12 {dimension_numbers = #tpu.dot_dimension_numbers<[1], [0], [0], [1], [0, 0, 1, 1], [], []>} : vector<1x32xf32>, vector<32x128xf32>, vector<1x128xf32> -> vector<1x128xf32>
    %19 = arith.addf %17, %18 : vector<1x128xf32>
    %20 = math.tanh %19 : vector<1x128xf32>
    %21 = arith.negf %19 : vector<1x128xf32>
    %22 = math.exp %21 : vector<1x128xf32>
    %cst_13 = arith.constant 1.000000e+00 : f32
    %23 = vector.broadcast %cst_13 : f32 to vector<1x128xf32>
    %24 = arith.addf %23, %22 : vector<1x128xf32>
    %25 = arith.divf %23, %24 : vector<1x128xf32>
    %26 = arith.select %14, %20, %25 : vector<1x128xi1>, vector<1x128xf32>
    %27 = vector.extract_strided_slice %26 {offsets = [0, 0], sizes = [1, 32], strides = [1, 1]} : vector<1x128xf32> to vector<1x32xf32>
    %28 = vector.extract_strided_slice %26 {offsets = [0, 32], sizes = [1, 32], strides = [1, 1]} : vector<1x128xf32> to vector<1x32xf32>
    %29 = vector.extract_strided_slice %26 {offsets = [0, 64], sizes = [1, 32], strides = [1, 1]} : vector<1x128xf32> to vector<1x32xf32>
    %30 = vector.extract_strided_slice %26 {offsets = [0, 96], sizes = [1, 32], strides = [1, 1]} : vector<1x128xf32> to vector<1x32xf32>
    %31 = arith.mulf %28, %16 : vector<1x32xf32>
    %32 = arith.mulf %27, %29 : vector<1x32xf32>
    %33 = arith.addf %31, %32 : vector<1x32xf32>
    %34 = math.tanh %33 : vector<1x32xf32>
    %35 = arith.mulf %30, %34 : vector<1x32xf32>
    %36 = math.tanh %35 : vector<1x32xf32>
    %37 = arith.mulf %36, %3 : vector<1x32xf32>
    %cst_14 = arith.constant dense<0.000000e+00> : vector<1xf32>
    %38 = vector.multi_reduction <add>, %37, %cst_14 [1] : vector<1x32xf32> to vector<1xf32>
    %39 = vector.shape_cast %38 : vector<1xf32> to vector<1x1xf32>
    %40 = vector.extract_strided_slice %8 {offsets = [1, 0], sizes = [1, 128], strides = [1, 1]} : vector<8x128xf32> to vector<1x128xf32>
    %cst_15 = arith.constant dense<0.000000e+00> : vector<1x128xf32>
    %41 = tpu.matmul %35, %1, %cst_15 {dimension_numbers = #tpu.dot_dimension_numbers<[1], [0], [0], [1], [0, 0, 1, 1], [], []>} : vector<1x32xf32>, vector<32x128xf32>, vector<1x128xf32> -> vector<1x128xf32>
    %42 = arith.addf %40, %41 : vector<1x128xf32>
    %43 = math.tanh %42 : vector<1x128xf32>
    %44 = arith.negf %42 : vector<1x128xf32>
    %45 = math.exp %44 : vector<1x128xf32>
    %cst_16 = arith.constant 1.000000e+00 : f32
    %46 = vector.broadcast %cst_16 : f32 to vector<1x128xf32>
    %47 = arith.addf %46, %45 : vector<1x128xf32>
    %48 = arith.divf %46, %47 : vector<1x128xf32>
    %49 = arith.select %14, %43, %48 : vector<1x128xi1>, vector<1x128xf32>
    %50 = vector.extract_strided_slice %49 {offsets = [0, 0], sizes = [1, 32], strides = [1, 1]} : vector<1x128xf32> to vector<1x32xf32>
    %51 = vector.extract_strided_slice %49 {offsets = [0, 32], sizes = [1, 32], strides = [1, 1]} : vector<1x128xf32> to vector<1x32xf32>
    %52 = vector.extract_strided_slice %49 {offsets = [0, 64], sizes = [1, 32], strides = [1, 1]} : vector<1x128xf32> to vector<1x32xf32>
    %53 = vector.extract_strided_slice %49 {offsets = [0, 96], sizes = [1, 32], strides = [1, 1]} : vector<1x128xf32> to vector<1x32xf32>
    %54 = arith.mulf %51, %33 : vector<1x32xf32>
    %55 = arith.mulf %50, %52 : vector<1x32xf32>
    %56 = arith.addf %54, %55 : vector<1x32xf32>
    %57 = math.tanh %56 : vector<1x32xf32>
    %58 = arith.mulf %53, %57 : vector<1x32xf32>
    %59 = math.tanh %58 : vector<1x32xf32>
    %60 = arith.mulf %59, %3 : vector<1x32xf32>
    %cst_17 = arith.constant dense<0.000000e+00> : vector<1xf32>
    %61 = vector.multi_reduction <add>, %60, %cst_17 [1] : vector<1x32xf32> to vector<1xf32>
    %62 = vector.shape_cast %61 : vector<1xf32> to vector<1x1xf32>
    %63 = vector.extract_strided_slice %8 {offsets = [2, 0], sizes = [1, 128], strides = [1, 1]} : vector<8x128xf32> to vector<1x128xf32>
    %cst_18 = arith.constant dense<0.000000e+00> : vector<1x128xf32>
    %64 = tpu.matmul %58, %1, %cst_18 {dimension_numbers = #tpu.dot_dimension_numbers<[1], [0], [0], [1], [0, 0, 1, 1], [], []>} : vector<1x32xf32>, vector<32x128xf32>, vector<1x128xf32> -> vector<1x128xf32>
    %65 = arith.addf %63, %64 : vector<1x128xf32>
    %66 = math.tanh %65 : vector<1x128xf32>
    %67 = arith.negf %65 : vector<1x128xf32>
    %68 = math.exp %67 : vector<1x128xf32>
    %cst_19 = arith.constant 1.000000e+00 : f32
    %69 = vector.broadcast %cst_19 : f32 to vector<1x128xf32>
    %70 = arith.addf %69, %68 : vector<1x128xf32>
    %71 = arith.divf %69, %70 : vector<1x128xf32>
    %72 = arith.select %14, %66, %71 : vector<1x128xi1>, vector<1x128xf32>
    %73 = vector.extract_strided_slice %72 {offsets = [0, 0], sizes = [1, 32], strides = [1, 1]} : vector<1x128xf32> to vector<1x32xf32>
    %74 = vector.extract_strided_slice %72 {offsets = [0, 32], sizes = [1, 32], strides = [1, 1]} : vector<1x128xf32> to vector<1x32xf32>
    %75 = vector.extract_strided_slice %72 {offsets = [0, 64], sizes = [1, 32], strides = [1, 1]} : vector<1x128xf32> to vector<1x32xf32>
    %76 = vector.extract_strided_slice %72 {offsets = [0, 96], sizes = [1, 32], strides = [1, 1]} : vector<1x128xf32> to vector<1x32xf32>
    %77 = arith.mulf %74, %56 : vector<1x32xf32>
    %78 = arith.mulf %73, %75 : vector<1x32xf32>
    %79 = arith.addf %77, %78 : vector<1x32xf32>
    %80 = math.tanh %79 : vector<1x32xf32>
    %81 = arith.mulf %76, %80 : vector<1x32xf32>
    %82 = math.tanh %81 : vector<1x32xf32>
    %83 = arith.mulf %82, %3 : vector<1x32xf32>
    %cst_20 = arith.constant dense<0.000000e+00> : vector<1xf32>
    %84 = vector.multi_reduction <add>, %83, %cst_20 [1] : vector<1x32xf32> to vector<1xf32>
    %85 = vector.shape_cast %84 : vector<1xf32> to vector<1x1xf32>
    %86 = vector.extract_strided_slice %8 {offsets = [3, 0], sizes = [1, 128], strides = [1, 1]} : vector<8x128xf32> to vector<1x128xf32>
    %cst_21 = arith.constant dense<0.000000e+00> : vector<1x128xf32>
    %87 = tpu.matmul %81, %1, %cst_21 {dimension_numbers = #tpu.dot_dimension_numbers<[1], [0], [0], [1], [0, 0, 1, 1], [], []>} : vector<1x32xf32>, vector<32x128xf32>, vector<1x128xf32> -> vector<1x128xf32>
    %88 = arith.addf %86, %87 : vector<1x128xf32>
    %89 = math.tanh %88 : vector<1x128xf32>
    %90 = arith.negf %88 : vector<1x128xf32>
    %91 = math.exp %90 : vector<1x128xf32>
    %cst_22 = arith.constant 1.000000e+00 : f32
    %92 = vector.broadcast %cst_22 : f32 to vector<1x128xf32>
    %93 = arith.addf %92, %91 : vector<1x128xf32>
    %94 = arith.divf %92, %93 : vector<1x128xf32>
    %95 = arith.select %14, %89, %94 : vector<1x128xi1>, vector<1x128xf32>
    %96 = vector.extract_strided_slice %95 {offsets = [0, 0], sizes = [1, 32], strides = [1, 1]} : vector<1x128xf32> to vector<1x32xf32>
    %97 = vector.extract_strided_slice %95 {offsets = [0, 32], sizes = [1, 32], strides = [1, 1]} : vector<1x128xf32> to vector<1x32xf32>
    %98 = vector.extract_strided_slice %95 {offsets = [0, 64], sizes = [1, 32], strides = [1, 1]} : vector<1x128xf32> to vector<1x32xf32>
    %99 = vector.extract_strided_slice %95 {offsets = [0, 96], sizes = [1, 32], strides = [1, 1]} : vector<1x128xf32> to vector<1x32xf32>
    %100 = arith.mulf %97, %79 : vector<1x32xf32>
    %101 = arith.mulf %96, %98 : vector<1x32xf32>
    %102 = arith.addf %100, %101 : vector<1x32xf32>
    %103 = math.tanh %102 : vector<1x32xf32>
    %104 = arith.mulf %99, %103 : vector<1x32xf32>
    %105 = math.tanh %104 : vector<1x32xf32>
    %106 = arith.mulf %105, %3 : vector<1x32xf32>
    %cst_23 = arith.constant dense<0.000000e+00> : vector<1xf32>
    %107 = vector.multi_reduction <add>, %106, %cst_23 [1] : vector<1x32xf32> to vector<1xf32>
    %108 = vector.shape_cast %107 : vector<1xf32> to vector<1x1xf32>
    %109 = vector.extract_strided_slice %8 {offsets = [4, 0], sizes = [1, 128], strides = [1, 1]} : vector<8x128xf32> to vector<1x128xf32>
    %cst_24 = arith.constant dense<0.000000e+00> : vector<1x128xf32>
    %110 = tpu.matmul %104, %1, %cst_24 {dimension_numbers = #tpu.dot_dimension_numbers<[1], [0], [0], [1], [0, 0, 1, 1], [], []>} : vector<1x32xf32>, vector<32x128xf32>, vector<1x128xf32> -> vector<1x128xf32>
    %111 = arith.addf %109, %110 : vector<1x128xf32>
    %112 = math.tanh %111 : vector<1x128xf32>
    %113 = arith.negf %111 : vector<1x128xf32>
    %114 = math.exp %113 : vector<1x128xf32>
    %cst_25 = arith.constant 1.000000e+00 : f32
    %115 = vector.broadcast %cst_25 : f32 to vector<1x128xf32>
    %116 = arith.addf %115, %114 : vector<1x128xf32>
    %117 = arith.divf %115, %116 : vector<1x128xf32>
    %118 = arith.select %14, %112, %117 : vector<1x128xi1>, vector<1x128xf32>
    %119 = vector.extract_strided_slice %118 {offsets = [0, 0], sizes = [1, 32], strides = [1, 1]} : vector<1x128xf32> to vector<1x32xf32>
    %120 = vector.extract_strided_slice %118 {offsets = [0, 32], sizes = [1, 32], strides = [1, 1]} : vector<1x128xf32> to vector<1x32xf32>
    %121 = vector.extract_strided_slice %118 {offsets = [0, 64], sizes = [1, 32], strides = [1, 1]} : vector<1x128xf32> to vector<1x32xf32>
    %122 = vector.extract_strided_slice %118 {offsets = [0, 96], sizes = [1, 32], strides = [1, 1]} : vector<1x128xf32> to vector<1x32xf32>
    %123 = arith.mulf %120, %102 : vector<1x32xf32>
    %124 = arith.mulf %119, %121 : vector<1x32xf32>
    %125 = arith.addf %123, %124 : vector<1x32xf32>
    %126 = math.tanh %125 : vector<1x32xf32>
    %127 = arith.mulf %122, %126 : vector<1x32xf32>
    %128 = math.tanh %127 : vector<1x32xf32>
    %129 = arith.mulf %128, %3 : vector<1x32xf32>
    %cst_26 = arith.constant dense<0.000000e+00> : vector<1xf32>
    %130 = vector.multi_reduction <add>, %129, %cst_26 [1] : vector<1x32xf32> to vector<1xf32>
    %131 = vector.shape_cast %130 : vector<1xf32> to vector<1x1xf32>
    %132 = vector.extract_strided_slice %8 {offsets = [5, 0], sizes = [1, 128], strides = [1, 1]} : vector<8x128xf32> to vector<1x128xf32>
    %cst_27 = arith.constant dense<0.000000e+00> : vector<1x128xf32>
    %133 = tpu.matmul %127, %1, %cst_27 {dimension_numbers = #tpu.dot_dimension_numbers<[1], [0], [0], [1], [0, 0, 1, 1], [], []>} : vector<1x32xf32>, vector<32x128xf32>, vector<1x128xf32> -> vector<1x128xf32>
    %134 = arith.addf %132, %133 : vector<1x128xf32>
    %135 = math.tanh %134 : vector<1x128xf32>
    %136 = arith.negf %134 : vector<1x128xf32>
    %137 = math.exp %136 : vector<1x128xf32>
    %cst_28 = arith.constant 1.000000e+00 : f32
    %138 = vector.broadcast %cst_28 : f32 to vector<1x128xf32>
    %139 = arith.addf %138, %137 : vector<1x128xf32>
    %140 = arith.divf %138, %139 : vector<1x128xf32>
    %141 = arith.select %14, %135, %140 : vector<1x128xi1>, vector<1x128xf32>
    %142 = vector.extract_strided_slice %141 {offsets = [0, 0], sizes = [1, 32], strides = [1, 1]} : vector<1x128xf32> to vector<1x32xf32>
    %143 = vector.extract_strided_slice %141 {offsets = [0, 32], sizes = [1, 32], strides = [1, 1]} : vector<1x128xf32> to vector<1x32xf32>
    %144 = vector.extract_strided_slice %141 {offsets = [0, 64], sizes = [1, 32], strides = [1, 1]} : vector<1x128xf32> to vector<1x32xf32>
    %145 = vector.extract_strided_slice %141 {offsets = [0, 96], sizes = [1, 32], strides = [1, 1]} : vector<1x128xf32> to vector<1x32xf32>
    %146 = arith.mulf %143, %125 : vector<1x32xf32>
    %147 = arith.mulf %142, %144 : vector<1x32xf32>
    %148 = arith.addf %146, %147 : vector<1x32xf32>
    %149 = math.tanh %148 : vector<1x32xf32>
    %150 = arith.mulf %145, %149 : vector<1x32xf32>
    %151 = math.tanh %150 : vector<1x32xf32>
    %152 = arith.mulf %151, %3 : vector<1x32xf32>
    %cst_29 = arith.constant dense<0.000000e+00> : vector<1xf32>
    %153 = vector.multi_reduction <add>, %152, %cst_29 [1] : vector<1x32xf32> to vector<1xf32>
    %154 = vector.shape_cast %153 : vector<1xf32> to vector<1x1xf32>
    %155 = vector.extract_strided_slice %8 {offsets = [6, 0], sizes = [1, 128], strides = [1, 1]} : vector<8x128xf32> to vector<1x128xf32>
    %cst_30 = arith.constant dense<0.000000e+00> : vector<1x128xf32>
    %156 = tpu.matmul %150, %1, %cst_30 {dimension_numbers = #tpu.dot_dimension_numbers<[1], [0], [0], [1], [0, 0, 1, 1], [], []>} : vector<1x32xf32>, vector<32x128xf32>, vector<1x128xf32> -> vector<1x128xf32>
    %157 = arith.addf %155, %156 : vector<1x128xf32>
    %158 = math.tanh %157 : vector<1x128xf32>
    %159 = arith.negf %157 : vector<1x128xf32>
    %160 = math.exp %159 : vector<1x128xf32>
    %cst_31 = arith.constant 1.000000e+00 : f32
    %161 = vector.broadcast %cst_31 : f32 to vector<1x128xf32>
    %162 = arith.addf %161, %160 : vector<1x128xf32>
    %163 = arith.divf %161, %162 : vector<1x128xf32>
    %164 = arith.select %14, %158, %163 : vector<1x128xi1>, vector<1x128xf32>
    %165 = vector.extract_strided_slice %164 {offsets = [0, 0], sizes = [1, 32], strides = [1, 1]} : vector<1x128xf32> to vector<1x32xf32>
    %166 = vector.extract_strided_slice %164 {offsets = [0, 32], sizes = [1, 32], strides = [1, 1]} : vector<1x128xf32> to vector<1x32xf32>
    %167 = vector.extract_strided_slice %164 {offsets = [0, 64], sizes = [1, 32], strides = [1, 1]} : vector<1x128xf32> to vector<1x32xf32>
    %168 = vector.extract_strided_slice %164 {offsets = [0, 96], sizes = [1, 32], strides = [1, 1]} : vector<1x128xf32> to vector<1x32xf32>
    %169 = arith.mulf %166, %148 : vector<1x32xf32>
    %170 = arith.mulf %165, %167 : vector<1x32xf32>
    %171 = arith.addf %169, %170 : vector<1x32xf32>
    %172 = math.tanh %171 : vector<1x32xf32>
    %173 = arith.mulf %168, %172 : vector<1x32xf32>
    %174 = math.tanh %173 : vector<1x32xf32>
    %175 = arith.mulf %174, %3 : vector<1x32xf32>
    %cst_32 = arith.constant dense<0.000000e+00> : vector<1xf32>
    %176 = vector.multi_reduction <add>, %175, %cst_32 [1] : vector<1x32xf32> to vector<1xf32>
    %177 = vector.shape_cast %176 : vector<1xf32> to vector<1x1xf32>
    %178 = vector.extract_strided_slice %8 {offsets = [7, 0], sizes = [1, 128], strides = [1, 1]} : vector<8x128xf32> to vector<1x128xf32>
    %cst_33 = arith.constant dense<0.000000e+00> : vector<1x128xf32>
    %179 = tpu.matmul %173, %1, %cst_33 {dimension_numbers = #tpu.dot_dimension_numbers<[1], [0], [0], [1], [0, 0, 1, 1], [], []>} : vector<1x32xf32>, vector<32x128xf32>, vector<1x128xf32> -> vector<1x128xf32>
    %180 = arith.addf %178, %179 : vector<1x128xf32>
    %181 = math.tanh %180 : vector<1x128xf32>
    %182 = arith.negf %180 : vector<1x128xf32>
    %183 = math.exp %182 : vector<1x128xf32>
    %cst_34 = arith.constant 1.000000e+00 : f32
    %184 = vector.broadcast %cst_34 : f32 to vector<1x128xf32>
    %185 = arith.addf %184, %183 : vector<1x128xf32>
    %186 = arith.divf %184, %185 : vector<1x128xf32>
    %187 = arith.select %14, %181, %186 : vector<1x128xi1>, vector<1x128xf32>
    %188 = vector.extract_strided_slice %187 {offsets = [0, 0], sizes = [1, 32], strides = [1, 1]} : vector<1x128xf32> to vector<1x32xf32>
    %189 = vector.extract_strided_slice %187 {offsets = [0, 32], sizes = [1, 32], strides = [1, 1]} : vector<1x128xf32> to vector<1x32xf32>
    %190 = vector.extract_strided_slice %187 {offsets = [0, 64], sizes = [1, 32], strides = [1, 1]} : vector<1x128xf32> to vector<1x32xf32>
    %191 = vector.extract_strided_slice %187 {offsets = [0, 96], sizes = [1, 32], strides = [1, 1]} : vector<1x128xf32> to vector<1x32xf32>
    %192 = arith.mulf %189, %171 : vector<1x32xf32>
    %193 = arith.mulf %188, %190 : vector<1x32xf32>
    %194 = arith.addf %192, %193 : vector<1x32xf32>
    %195 = math.tanh %194 : vector<1x32xf32>
    %196 = arith.mulf %191, %195 : vector<1x32xf32>
    %197 = math.tanh %196 : vector<1x32xf32>
    %198 = arith.mulf %197, %3 : vector<1x32xf32>
    %cst_35 = arith.constant dense<0.000000e+00> : vector<1xf32>
    %199 = vector.multi_reduction <add>, %198, %cst_35 [1] : vector<1x32xf32> to vector<1xf32>
    %200 = vector.shape_cast %199 : vector<1xf32> to vector<1x1xf32>
    %201 = arith.maximumf %39, %62 : vector<1x1xf32>
    %202 = arith.maximumf %201, %85 : vector<1x1xf32>
    %203 = arith.maximumf %202, %108 : vector<1x1xf32>
    %204 = arith.maximumf %203, %131 : vector<1x1xf32>
    %205 = arith.maximumf %204, %154 : vector<1x1xf32>
    %206 = arith.maximumf %205, %177 : vector<1x1xf32>
    %207 = arith.maximumf %206, %200 : vector<1x1xf32>
    %208 = arith.subf %39, %207 : vector<1x1xf32>
    %209 = math.exp %208 : vector<1x1xf32>
    %210 = arith.subf %62, %207 : vector<1x1xf32>
    %211 = math.exp %210 : vector<1x1xf32>
    %212 = arith.subf %85, %207 : vector<1x1xf32>
    %213 = math.exp %212 : vector<1x1xf32>
    %214 = arith.subf %108, %207 : vector<1x1xf32>
    %215 = math.exp %214 : vector<1x1xf32>
    %216 = arith.subf %131, %207 : vector<1x1xf32>
    %217 = math.exp %216 : vector<1x1xf32>
    %218 = arith.subf %154, %207 : vector<1x1xf32>
    %219 = math.exp %218 : vector<1x1xf32>
    %220 = arith.subf %177, %207 : vector<1x1xf32>
    %221 = math.exp %220 : vector<1x1xf32>
    %222 = arith.subf %200, %207 : vector<1x1xf32>
    %223 = math.exp %222 : vector<1x1xf32>
    %224 = arith.addf %209, %211 : vector<1x1xf32>
    %225 = arith.addf %224, %213 : vector<1x1xf32>
    %226 = arith.addf %225, %215 : vector<1x1xf32>
    %227 = arith.addf %226, %217 : vector<1x1xf32>
    %228 = arith.addf %227, %219 : vector<1x1xf32>
    %229 = arith.addf %228, %221 : vector<1x1xf32>
    %230 = arith.addf %229, %223 : vector<1x1xf32>
    %cst_36 = arith.constant 1.000000e+00 : f32
    %231 = vector.broadcast %cst_36 : f32 to vector<1x1xf32>
    %232 = arith.divf %231, %230 : vector<1x1xf32>
    %233 = arith.mulf %209, %232 : vector<1x1xf32>
    %234 = vector.broadcast %233 : vector<1x1xf32> to vector<1x32xf32>
    %235 = arith.mulf %35, %234 : vector<1x32xf32>
    %236 = arith.mulf %211, %232 : vector<1x1xf32>
    %237 = vector.broadcast %236 : vector<1x1xf32> to vector<1x32xf32>
    %238 = arith.mulf %58, %237 : vector<1x32xf32>
    %239 = arith.addf %235, %238 : vector<1x32xf32>
    %240 = arith.mulf %213, %232 : vector<1x1xf32>
    %241 = vector.broadcast %240 : vector<1x1xf32> to vector<1x32xf32>
    %242 = arith.mulf %81, %241 : vector<1x32xf32>
    %243 = arith.addf %239, %242 : vector<1x32xf32>
    %244 = arith.mulf %215, %232 : vector<1x1xf32>
    %245 = vector.broadcast %244 : vector<1x1xf32> to vector<1x32xf32>
    %246 = arith.mulf %104, %245 : vector<1x32xf32>
    %247 = arith.addf %243, %246 : vector<1x32xf32>
    %248 = arith.mulf %217, %232 : vector<1x1xf32>
    %249 = vector.broadcast %248 : vector<1x1xf32> to vector<1x32xf32>
    %250 = arith.mulf %127, %249 : vector<1x32xf32>
    %251 = arith.addf %247, %250 : vector<1x32xf32>
    %252 = arith.mulf %219, %232 : vector<1x1xf32>
    %253 = vector.broadcast %252 : vector<1x1xf32> to vector<1x32xf32>
    %254 = arith.mulf %150, %253 : vector<1x32xf32>
    %255 = arith.addf %251, %254 : vector<1x32xf32>
    %256 = arith.mulf %221, %232 : vector<1x1xf32>
    %257 = vector.broadcast %256 : vector<1x1xf32> to vector<1x32xf32>
    %258 = arith.mulf %173, %257 : vector<1x32xf32>
    %259 = arith.addf %255, %258 : vector<1x32xf32>
    %260 = arith.mulf %223, %232 : vector<1x1xf32>
    %261 = vector.broadcast %260 : vector<1x1xf32> to vector<1x32xf32>
    %262 = arith.mulf %196, %261 : vector<1x32xf32>
    %263 = arith.addf %259, %262 : vector<1x32xf32>
    %c0_37 = arith.constant 0 : index
    %c0_38 = arith.constant 0 : index
    %264 = vector.load %arg6[%c0_37, %c0_38] : memref<32x4xf32, #tpu.memory_space<vmem>>, vector<32x4xf32>
    %c0_39 = arith.constant 0 : index
    %c0_40 = arith.constant 0 : index
    %265 = vector.load %arg7[%c0_39, %c0_40] : memref<1x4xf32, #tpu.memory_space<vmem>>, vector<1x4xf32>
    %266 = math.tanh %263 : vector<1x32xf32>
    %cst_41 = arith.constant dense<0.000000e+00> : vector<1x4xf32>
    %267 = tpu.matmul %266, %264, %cst_41 {dimension_numbers = #tpu.dot_dimension_numbers<[1], [0], [0], [1], [0, 0, 1, 1], [], []>} : vector<1x32xf32>, vector<32x4xf32>, vector<1x4xf32> -> vector<1x4xf32>
    %268 = arith.addf %267, %265 : vector<1x4xf32>
    %c0_42 = arith.constant 0 : index
    %c0_43 = arith.constant 0 : index
    %c0_44 = arith.constant 0 : index
    %269 = vector.load %arg8[%c0_42, %c0_43, %c0_44] : memref<1x1x4xf32, #tpu.memory_space<vmem>>, vector<1x1x4xf32>
    %270 = vector.shape_cast %269 : vector<1x1x4xf32> to vector<1x4xf32>
    %271 = vector.shape_cast %268 : vector<1x4xf32> to vector<1x1x4xf32>
    tpu.vector_store %arg8[%c0_42, %c0_43, %c0_44], %271 {strides = array<i32>} : memref<1x1x4xf32, #tpu.memory_space<vmem>>, vector<1x1x4xf32>,
    return
  }
  func.func @transform_0(%arg0: i32) -> (i32, i32, i32) {
    %c0_i32 = arith.constant 0 : i32
    %c0_i32_0 = arith.constant 0 : i32
    %c0_i32_1 = arith.constant 0 : i32
    return %arg0, %c0_i32, %c0_i32_0 : i32, i32, i32
  }
  func.func @transform_1(%arg0: i32) -> (i32, i32) {
    %c0_i32 = arith.constant 0 : i32
    %c0_i32_0 = arith.constant 0 : i32
    %c0_i32_1 = arith.constant 0 : i32
    return %c0_i32, %c0_i32_0 : i32, i32
  }
  func.func @transform_2(%arg0: i32) -> (i32, i32) {
    %c0_i32 = arith.constant 0 : i32
    %c0_i32_0 = arith.constant 0 : i32
    %c0_i32_1 = arith.constant 0 : i32
    return %c0_i32, %c0_i32_0 : i32, i32
  }
  func.func @transform_3(%arg0: i32) -> (i32, i32) {
    %c0_i32 = arith.constant 0 : i32
    %c0_i32_0 = arith.constant 0 : i32
    %c0_i32_1 = arith.constant 0 : i32
    return %c0_i32, %c0_i32_0 : i32, i32
  }
  func.func @transform_4(%arg0: i32) -> (i32, i32) {
    %c0_i32 = arith.constant 0 : i32
    %c0_i32_0 = arith.constant 0 : i32
    %c0_i32_1 = arith.constant 0 : i32
    return %c0_i32, %c0_i32_0 : i32, i32
  }
  func.func @transform_5(%arg0: i32) -> (i32, i32) {
    %c0_i32 = arith.constant 0 : i32
    %c0_i32_0 = arith.constant 0 : i32
    %c0_i32_1 = arith.constant 0 : i32
    return %c0_i32, %c0_i32_0 : i32, i32
  }
  func.func @transform_6(%arg0: i32) -> (i32, i32) {
    %c0_i32 = arith.constant 0 : i32
    %c0_i32_0 = arith.constant 0 : i32
    %c0_i32_1 = arith.constant 0 : i32
    return %c0_i32, %c0_i32_0 : i32, i32
  }
  func.func @transform_7(%arg0: i32) -> (i32, i32, i32) {
    %c0_i32 = arith.constant 0 : i32
    %c0_i32_0 = arith.constant 0 : i32
    %c0_i32_1 = arith.constant 0 : i32
    return %arg0, %c0_i32, %c0_i32_0 : i32, i32, i32
  }
}

</mosaic_0001>

<bundles_post_ra>
// kernel: tpu_custom_call.1
= control target key start
LH: loop header
LB: loop body
LE: loop exit
PB: predicated region body
PF: predicated region fallthrough
CT: control target
= control target key end

     0   :  { %12 = vsyncpa [#allocation3], 0  ;;  %s2712_s0 = inlined_call_operand.hbm [shape: f32[2,8,16], index: 0, kind: input, shape index: {}]   ;;  %s2713_s1 = inlined_call_operand.hbm [shape: f32[16,128], index: 1, kind: input, shape index: {}]   ;;  %s2714_s2 = inlined_call_operand.vmem [shape: f32[32,128], index: 2, kind: input, shape index: {}]   ;;  %s2715_s3 = inlined_call_operand.vmem [shape: f32[1,128], index: 3, kind: input, shape index: {}]   ;;  %s2716_s4 = inlined_call_operand.vmem [shape: f32[1,32], index: 4, kind: input, shape index: {}]   ;;  %s2717_s5 = inlined_call_operand.vmem [shape: f32[32,4], index: 5, kind: input, shape index: {}]   ;;  %s2718_s6 = inlined_call_operand.vmem [shape: f32[1,4], index: 6, kind: input, shape index: {}]   ;;  %s2719_s7 = inlined_call_operand.hbm [shape: f32[2,1,4], index: 7, kind: output, shape index: {}]  }
   0x1   :  { %14 = vsyncpa [#allocation3 + $0x1], 0 }
   0x2   :  { %15 = vsyncpa [#allocation6], 0 }
   0x3   :  { %16 = vsyncpa [#allocation4], 0 }
   0x4   :  { %18 = vsyncpa [#allocation4 + $0x1], 0  ;;  %s2305_s24 = smov 0   ;;  %s2307_s25 = smov 0  }
   0x5   :  { %s2309_s26 = smov 0   ;;  %s2311_s27 = smov 0  }
   0x6 LB: > { %s2326_s28 = sadd.s32 4294967295, %s2251_s27   ;;  %s1713_s29 = sadd.s32 4294967294, %s2251_s27   ;;  %s2251_s27 = sphi %s2311_s27, %s2741_s27   ;;  %s2247_s26 = sphi %s2309_s26, %s2740_s26   ;;  %s2243_s25 = sphi %s2307_s25, %s2739_s25   ;;  %s2239_s24 = sphi %s2305_s24, %s2738_s24  }
   0x7   : > { %p44_p0 = scmp.ne.s32.totalorder %s2243_s25, %s2239_s24  ;;  %p2720_p1 = scmp.eq.s32.totalorder %s2326_s28, 0 }
   0x8   : > { %p200_p3 = scmp.eq.s32.totalorder %s1713_s29, 1  ;;  %p1714_p5 = scmp.ge.s32.totalorder %s2251_s27, 1 }
   0x9   : > { %p2335_p4 = por %p2720_p1, %p44_p0  ;;  %p207_p7 = scmp.lt.s32.totalorder %s2251_s27, 3 }
   0xa   : > { %p2340_p6 = por %p200_p3, %p44_p0  ;;  %s2253_s10 = smov [#allocation5]  }
   0xb   : > { %s2723_s30 = scalar_select %p2335_p4, 1, 0 }
   0xc   : > { %s2724_s8 = scalar_select %p2340_p6, 1, 0 }
   0xd   : > { %p2345_p8 = pnand %p1714_p5, %p207_p7  ;;  %s219_s11 = sshll.u32 %s2253_s10, 4  ;;  %s2349_s11 = int_to_ptr.vmem [resolvable:$true] %s219_s11 }
   0xe   : > { %s2361_s13 = sadd.s32 1, %s2251_s27   ;;  %s31_s14 = sadd.s32 1, %s2247_s26 }
   0xf   : > { %s2725_s9 = scalar_select %p2345_p8, 1, 0 }
  0x10   : > { %p1963_p9 = pneg %p2345_p8  ;;  %s28_s15 = ssub.s32 %s2251_s27, %s2361_s13 }
  0x11   : > { %s2123_s18 = scalar_lea.hbm %s2713_s1, 256 }
  0x12   : > { %p2356_p11 = pnand %p1963_p9, %p2720_p1  ;;  %p2124_p12 = scmp.ne.s32.totalorder %s2713_s1, %s2123_s18 }
  0x13   : > { %p2130_p5 = scmp.lt.u32.totalorder %s2123_s18, %s2713_s1 }
  0x14   : > { %p2125_p13 = pneg %p2356_p11 }
  0x16   : > { %p2126_p0 = pnand %p2125_p13, %p2124_p12 }
  0x18   : > { %p2127_p3 = pneg %p2126_p0 }
  0x1a   : > { %p2132_p7 = pnand %p2130_p5, %p2127_p3 }
  0x1c   : > { %2135 = shalt.err (!%p2132_p7)
}
  0x1d   : > { %s2136_s23 = scalar_lea.vmem %s2349_s11, 256  ;;  %p2144_p2 = scmp.lt.s32.totalorder %s2349_s11, %s2349_s11 }
  0x1e   : > { %p2137_p9 = scmp.ne.s32.totalorder %s2349_s11, %s2136_s23  ;;  %p2145_p6 = scmp.lt.s32.totalorder %s2136_s23, %s2136_s23 }
  0x20   : > { %p2139_p10 = pnand %p2137_p9, %p2125_p13  ;;  %p2146_p4 = por %p2145_p6, %p2144_p2 }
  0x22   : > { %p2140_p1 = pneg %p2139_p10 }
  0x24   : > { %p2147_p8 = pnand %p2146_p4, %p2140_p1 }
  0x26   : > { %2150 = shalt.err (!%p2147_p8)
}
  0x27   : > { %s2254_s29 = smov 128   ;;  %s2255_s10 = smov 8  }
  0x28   : > { %1966 = dma.hbm_to_vmem [thread:$0]  (!%p2356_p11), %s2713_s1, 256, %s2349_s11, [#allocation6], %s2254_s29, %s2254_s29, %s2255_s10  }
  0x29   : > { %p29_p2 = scmp.eq.s32.totalorder %s28_s15, 0  ;;  %p38_p1 = scmp.ne.s32.totalorder %s2247_s26, %s2243_s25 }
  0x2a   : > { %p39_p4 = scmp.eq.s32.totalorder %s2251_s27, 0  ;;  %p1976_p6 = scmp.lt.s32.totalorder %s2251_s27, 2 }
  0x2b   : > { %s2392_s18 = scalar_select %p29_p2, %s2247_s26, %s31_s14  }
  0x2c   : > { %p40_p8 = por %p39_p4, %p38_p1  ;;  %p2727_p10 = scmp.eq.s32.totalorder %s2326_s28, 1 }
  0x2d   : > { %s248_s20 = sand.u32 1, %s2247_s26   ;;  %s1718_s21 = sshll.u32 %s2251_s27, 7 }
  0x2e   : > { %p2396_p12 = por %p2727_p10, %p38_p1  ;;  %s1717_s22 = sshll.u32 %s248_s20, 3 }
  0x2f   : > { %s2405_s16 = scalar_lea.hbm %s2712_s0, %s1718_s21  ;;  %s252_s11 = scalar_lea.vmem [#allocation2], %s1717_s22 }
  0x30   : > { %s259_s14 = sshll.u32 %s252_s11, 4  ;;  %p2407_p11 = pnand %p1976_p6, %p40_p8  ;;  %s2411_s14 = int_to_ptr.vmem [resolvable:$true] %s259_s14 }
  0x31   : > { %s249_s29 = scalar_lea.sflag [#allocation3], %s248_s20  ;;  %s2151_s10 = scalar_lea.hbm %s2405_s16, 128 }
  0x32   : > { %p2152_p13 = scmp.ne.s32.totalorder %s2405_s16, %s2151_s10  ;;  %p2153_p0 = pneg %p2407_p11 }
  0x33   : > { %s2156_s22 = scalar_lea.hbm %s2712_s0, 256  ;;  %p2157_p7 = scmp.lt.u32.totalorder %s2405_s16, %s2712_s0 }
  0x34   : > { %p2154_p3 = pnand %p2153_p0, %p2152_p13  ;;  %p2158_p9 = scmp.lt.u32.totalorder %s2156_s22, %s2151_s10 }
  0x35   : > { %p2160_p1 = scmp.lt.u32.totalorder %s2151_s10, %s2405_s16 }
  0x36   : > { %p2155_p5 = pneg %p2154_p3  ;;  %p2159_p2 = por %p2158_p9, %p2157_p7 }
  0x38   : > { %p2161_p4 = por %p2160_p1, %p2159_p2 }
  0x3a   : > { %p2162_p6 = pnand %p2161_p4, %p2155_p5 }
  0x3c   : > { %2165 = shalt.err (!%p2162_p6)
}
  0x3d   : > { %s2166_s20 = scalar_lea.vmem %s2411_s14, 128  ;;  %s2256_s11 = smov [#allocation2]  }
  0x3e   : > { %p2167_p8 = scmp.ne.s32.totalorder %s2411_s14, %s2166_s20  ;;  %s2171_s17 = sshll.u32 %s2256_s11, 4  ;;  %s2172_s17 = int_to_ptr.vmem [resolvable:$false] %s2171_s17 }
  0x3f   : > { %s2173_s21 = scalar_lea.vmem %s2172_s17, 256  ;;  %p2174_p3 = scmp.lt.s32.totalorder %s2411_s14, %s2172_s17 }
  0x40   : > { %p2169_p10 = pnand %p2167_p8, %p2153_p0  ;;  %p2175_p7 = scmp.lt.s32.totalorder %s2173_s21, %s2166_s20 }
  0x42   : > { %p2170_p13 = pneg %p2169_p10  ;;  %p2176_p9 = por %p2175_p7, %p2174_p3 }
  0x44   : > { %p2177_p2 = pnand %p2176_p9, %p2170_p13 }
  0x46   : > { %2180 = shalt.err (!%p2177_p2)
}
  0x47   : > { %1970 = dma.hbm_to_vmem [thread:$0]  (!%p2407_p11), %s2405_s16, 128, %s2411_s14, %s249_s29  }
  0x48   : > { %p2730_p5 = scmp.ne.s32.totalorder %s2725_s9, 0 }
  0x49   : > { %s2441_s10 = sand.u32 (!%p2730_p5), 1, %s2243_s25   ;;  %p2731_p0 = scmp.ne.s32.totalorder (!%p2730_p5), %s2723_s30, 0 }
  0x4a   : > { %268 = sbr.rel (%p2730_p5) target bundleno = 6585 (0x19b9), region = 48  ;;  %s1720_s22 = sshll.u32 (!%p2730_p5), %s2441_s10, 3 }
  0x4b   : > { %s271_s12 = scalar_lea.sflag (!%p2730_p5), [#allocation3], %s2441_s10  ;;  %s274_s23 = scalar_lea.vmem (!%p2730_p5), [#allocation2], %s1720_s22 }
  0x51   : > { %2226 = dma.done.wait (%p2731_p0), %s271_s12, 128  }
  0x52   : > { %2228 = vsyncadd (%p2731_p0), %s271_s12, 4294967168  ;;  %p2732_p1 = scmp.eq.s32.totalorder %s2326_s28, 0 }
  0x54   : > { %2230 = dma.done.wait (%p2732_p1), [#allocation6], 256   ;;  %p2733_p11 = pmov %p2732_p1 }
  0x55   : > { %v2257_v0 = vmov 0.0|0.0   ;;  %vm2258_vm0 = vmmov 0   ;;  %v2259_v1 = vmov 0.0   ;;  %v310_v2 = vld [vmem:[%s2714_s2] sm:$0xff]  ;;  %v311_v3 = vld [vmem:[%s2714_s2 + $0x8] sm:$0xff]  ;;  %v308_v4 = vld [vmem:[#allocation5] sm:$0xff]  ;;  %v397_v21 = vlaneseq }
  0x56   : > { %2232 = vsyncadd (%p2733_p11), [#allocation6], 4294967040  ;;  %1901 = vmatprep.subr.bf16.mxu1 %v2257_v0  ;;  %1898 = vmatprep.subr.bf16.mxu0 %v2257_v0  ;;  %v2465_v5 = vpack.c.bf16 %v311_v3, %v310_v2  ;;  %v309_v6 = vld [vmem:[#allocation5 + $0x8] sm:$0xff]  ;;  %v312_v7 = vld [vmem:[%s2714_s2 + $0x10] sm:$0xff]  ;;  %vm323_vm1 = vcmask 130048   ;;  %s2260_s22 = smov 64  }
  0x57   : > { %1796 = vmatprep.mubr.msk.f32.mxu0 %vm2258_vm0, %v2259_v1  ;;  %1807 = vmatprep.mubr.msk.f32.mxu1 %vm2258_vm0, %v2259_v1  ;;  %v1899_v8 = vpack.c.bf16 %v309_v6, %v308_v4  ;;  %v313_v9 = vld [vmem:[%s2714_s2 + $0x18] sm:$0xff]  ;;  %v316_v11 = vld [vmem:[%s274_s23] sm:$0xff]  ;;  %v398_v23 = vand.u32 127, %v397_v21  ;;  %s2261_s12 = smov 32   ;;  %vm402_vm5 = vcmask 261120   ;;  %s2262_s9 = smov 96  }
  0x58   : > { %1903 = vmatpush3.bf16.msra.mxu1 %v2465_v5  ;;  %v2474_v10 = vpack.c.bf16 %v313_v9, %v312_v7  ;;  %v1722_v12 = vld [vmem:[%s2715_s3] ss:$0 sm:$0xff]  ;;  %vm633_vm6 = vcmask 254977   ;;  %vm751_vm7 = vcmask 256002   ;;  %vm869_vm8 = vcmask 257027   ;;  %s1741_s30 = sshll.u32 %s2326_s28, 4 }
  0x59   : > { %1900 = vmatpush3.bf16.msra.mxu0 %v1899_v8  ;;  %1904 = vmatprep.subr.bf16.mxu1 %v2257_v0  ;;  %vm399_vm2 = vcmp.ge.s32.totalorder %v398_v23, 64  ;;  %vm400_vm3 = vcmp.lt.s32.totalorder %v398_v23, 96  ;;  %vm1105_vm9 = vcmask 259077   ;;  %vm516_vm10 = vcmask 253952   ;;  %s2668_s29 = scalar_lea.hbm %s2719_s7, %s1741_s30  ;;  %s2264_s28 = smov [#allocation7]  }
  0x5a   : > { %1907 = vmatprep.subr.bf16.mxu0 %v2257_v0  ;;  %vm2499_vm4 = vmand %vm399_vm2, %vm400_vm3  ;;  %vm987_vm11 = vcmask 258052   ;;  %vm1223_vm12 = vcmask 260102   ;;  %vm1341_vm13 = vcmask 261127   ;;  %vm1622_vm14 = vcmask 24576   ;;  %s2185_s11 = sshll.u32 %s2264_s28, 4  ;;  %s2186_s11 = int_to_ptr.vmem [resolvable:$false] %s2185_s11 }
  0x5b   : > { %s2187_s17 = scalar_lea.vmem %s2186_s11, 32 }
  0x5c   : > { %1797 = vmatmul.mubr.msk.f32.vlgmr.msra.gmra.mrb[0].mxu0 %vm323_vm1, %v316_v11  ;;  %1906 = vmatpush3.bf16.msra.mxu1 %v2474_v10 }
  0x5d   : > { %1909 = vmatpush3.bf16.msra.mxu0 %v2465_v5  ;;  %1818 = vmatprep.mubr.msk.f32.mxu0 %vm2258_vm0, %v2259_v1 }
  0x5e   : > { %1910 = vmatprep.subr.bf16.mxu0 %v2257_v0  ;;  %1913 = vmatprep.subr.bf16.mxu1 %v2257_v0 }
  0x5f   : > { %1808 = vmatmul.mubr.f32.vlgmr.msra.gmra.mrb[0].mxu1 %v2259_v1 }
  0x60   : > { %1915 = vmatpush3.bf16.msra.mxu1 %v2465_v5  ;;  %1829 = vmatprep.mubr.msk.f32.mxu1 %vm2258_vm0, %v2259_v1 }
  0x61   : > { %1912 = vmatpush3.bf16.msra.mxu0 %v2474_v10  ;;  %1916 = vmatprep.subr.bf16.mxu1 %v2257_v0 }
  0x62   : > { %1919 = vmatprep.subr.bf16.mxu0 %v2257_v0 }
  0x64   : > { %1918 = vmatpush3.bf16.msra.mxu1 %v2474_v10 }
  0x65   : > { %1925 = vmatprep.subr.bf16.mxu1 %v2257_v0 }
 0x12f   : > { %v393_v13 = vpop.f32.mrb[0].mxu0 }
 0x130   : > { %v2496_v14 = vadd.f32 %v1722_v12, %v393_v13  ;;  %v1798_v15 = vpop.f32.mrb[1].mxu0 }
 0x132   : > { %v472_v16 = vpop.f32.mrb[0].mxu1 }
 0x133   : > { %v476_v17 = vadd.f32 %v472_v16, %v2496_v14  ;;  %v1809_v18 = vpop.f32.mrb[1].mxu1 }
 0x135   : > { %v1724_v19 = vmul.f32 -1.442695, %v476_v17 }
 0x137   : > { %2023 = vpow2.f32 %v1724_v19 }
 0x138   : > { %2025 = vtanh.f32 %v476_v17 }
 0x141   : > { %v2024_v20 = vpop.eup %2023 }
 0x142   : > { %v481_v22 = vadd.f32 1.0, %v2024_v20  ;;  %v2026_v25 = vpop.eup %2025 }
 0x144   : > { %2027 = vrcp.f32 %v481_v22 }
 0x14e   : > { %v2028_v26 = vpop.eup %2027 }
 0x14f   : > { %v484_v27 = vsel %vm2499_vm4, %v2026_v25, %v2028_v26 }
 0x150   : > { %487 = vrot.lane.b32.xlu0 %v484_v27, %s2260_s22  ;;  %v485_v30 = vmul.f32 0.0, %v484_v27 }
 0x1c2   : > { %v488_v28 = vpop.permute.xlu0 %487 }
 0x1c3   : > { %v490_v29 = vmul.f32 %v488_v28, %v484_v27 }
 0x1c5   : > { %492 = vrot.lane.b32.xlu0 %v490_v29, %s2261_s12 }
 0x237   : > { %v493_v31 = vpop.permute.xlu0 %492 }
 0x238   : > { %v495_v32 = vadd.f32 %v493_v31, %v485_v30 }
 0x23a   : > { %2029 = vtanh.f32 %v495_v32  ;;  %v608_v49 = vrot.slane %v495_v32, 7 }
 0x244   : > { %v2030_v33 = vpop.eup %2029 }
 0x245   : > { %498 = vrot.lane.b32.xlu1 %v2030_v33, %s2260_s22 }
 0x2b7   : > { %v499_v34 = vpop.permute.xlu1 %498 }
 0x2b8   : > { %v2508_v35 = vmul.f32 %v499_v34, %v484_v27 }
 0x2ba   : > { %521 = vrot.lane.b32.xlu1 %v2508_v35, %s2261_s12 }
 0x32c   : > { %v522_v36 = vpop.permute.xlu1 %521 }
 0x32d   : > { %1819 = vmatmul.mubr.msk.f32.vlgmr.msra.gmra.mrb[2].mxu0 %vm402_vm5, %v522_v36 }
 0x32e   : > { %1921 = vmatpush3.bf16.msra.mxu0 %v2465_v5  ;;  %1840 = vmatprep.mubr.msk.f32.mxu0 %vm2258_vm0, %v2259_v1 }
 0x32f   : > { %1922 = vmatprep.subr.bf16.mxu0 %v2257_v0 }
 0x332   : > { %1924 = vmatpush3.bf16.msra.mxu0 %v2474_v10 }
 0x333   : > { %1931 = vmatprep.subr.bf16.mxu0 %v2257_v0 }
 0x400   : > { %v591_v37 = vpop.f32.mrb[2].mxu0 }
 0x401   : > { %v596_v38 = vrot.slane %v591_v37, 7  ;;  %v1820_v39 = vpop.f32.mrb[3].mxu0 }
 0x403   : > { %v598_v40 = vadd.f32 %v596_v38, %v2496_v14 }
 0x405   : > { %v1727_v41 = vmul.f32 -1.442695, %v598_v40 }
 0x407   : > { %2031 = vpow2.f32 %v1727_v41 }
 0x408   : > { %2033 = vtanh.f32 %v598_v40 }
 0x411   : > { %v2032_v42 = vpop.eup %2031 }
 0x412   : > { %v603_v43 = vadd.f32 1.0, %v2032_v42  ;;  %v2034_v44 = vpop.eup %2033 }
 0x414   : > { %2035 = vrcp.f32 %v603_v43 }
 0x41e   : > { %v2036_v45 = vpop.eup %2035 }
 0x41f   : > { %v606_v46 = vsel %vm2499_vm4, %v2034_v44, %v2036_v45 }
 0x420   : > { %612 = vrot.lane.b32.xlu0 %v606_v46, %s2260_s22  ;;  %v610_v50 = vmul.f32 %v608_v49, %v606_v46 }
 0x492   : > { %v613_v47 = vpop.permute.xlu0 %612 }
 0x493   : > { %v615_v48 = vmul.f32 %v613_v47, %v606_v46 }
 0x495   : > { %617 = vrot.lane.b32.xlu1 %v615_v48, %s2261_s12 }
 0x507   : > { %v618_v51 = vpop.permute.xlu1 %617 }
 0x508   : > { %v620_v52 = vadd.f32 %v618_v51, %v610_v50 }
 0x50a   : > { %2037 = vtanh.f32 %v620_v52  ;;  %v726_v9 = vrot.slane %v620_v52, 7 }
 0x514   : > { %v2038_v53 = vpop.eup %2037 }
 0x515   : > { %623 = vrot.lane.b32.xlu0 %v2038_v53, %s2260_s22 }
 0x587   : > { %v624_v54 = vpop.permute.xlu0 %623 }
 0x588   : > { %v2525_v55 = vmul.f32 %v624_v54, %v606_v46 }
 0x58a   : > { %v638_v56 = vrot.slane %v2525_v55, 1 }
 0x58c   : > { %639 = vrot.lane.b32.xlu1 %v638_v56, %s2261_s12 }
 0x5fe   : > { %v640_v57 = vpop.permute.xlu1 %639 }
 0x5ff   : > { %1830 = vmatmul.mubr.msk.f32.vlgmr.msra.gmra.mrb[2].mxu1 %vm402_vm5, %v640_v57 }
 0x600   : > { %1927 = vmatpush3.bf16.msra.mxu1 %v2465_v5  ;;  %1851 = vmatprep.mubr.msk.f32.mxu1 %vm2258_vm0, %v2259_v1 }
 0x601   : > { %1928 = vmatprep.subr.bf16.mxu1 %v2257_v0 }
 0x604   : > { %1930 = vmatpush3.bf16.msra.mxu1 %v2474_v10 }
 0x605   : > { %1937 = vmatprep.subr.bf16.mxu1 %v2257_v0 }
 0x6d2   : > { %v709_v58 = vpop.f32.mrb[2].mxu1 }
 0x6d3   : > { %v714_v59 = vrot.slane %v709_v58, 6  ;;  %v1831_v60 = vpop.f32.mrb[3].mxu1 }
 0x6d5   : > { %v716_v61 = vadd.f32 %v714_v59, %v2496_v14 }
 0x6d7   : > { %v1729_v62 = vmul.f32 -1.442695, %v716_v61 }
 0x6d9   : > { %2039 = vpow2.f32 %v1729_v62 }
 0x6da   : > { %2041 = vtanh.f32 %v716_v61 }
 0x6e3   : > { %v2040_v63 = vpop.eup %2039 }
 0x6e4   : > { %v721_v2 = vadd.f32 1.0, %v2040_v63  ;;  %v2042_v3 = vpop.eup %2041 }
 0x6e6   : > { %2043 = vrcp.f32 %v721_v2 }
 0x6f0   : > { %v2044_v4 = vpop.eup %2043 }
 0x6f1   : > { %v724_v6 = vsel %vm2499_vm4, %v2042_v3, %v2044_v4 }
 0x6f2   : > { %730 = vrot.lane.b32.xlu0 %v724_v6, %s2260_s22  ;;  %v728_v11 = vmul.f32 %v726_v9, %v724_v6 }
 0x764   : > { %v731_v7 = vpop.permute.xlu0 %730 }
 0x765   : > { %v733_v8 = vmul.f32 %v731_v7, %v724_v6 }
 0x767   : > { %735 = vrot.lane.b32.xlu1 %v733_v8, %s2261_s12 }
 0x7d9   : > { %v736_v12 = vpop.permute.xlu1 %735 }
 0x7da   : > { %v738_v13 = vadd.f32 %v736_v12, %v728_v11 }
 0x7dc   : > { %2045 = vtanh.f32 %v738_v13  ;;  %v844_v33 = vrot.slane %v738_v13, 7 }
 0x7e6   : > { %v2046_v15 = vpop.eup %2045 }
 0x7e7   : > { %741 = vrot.lane.b32.xlu0 %v2046_v15, %s2260_s22 }
 0x859   : > { %v742_v16 = vpop.permute.xlu0 %741 }
 0x85a   : > { %v2542_v17 = vmul.f32 %v742_v16, %v724_v6 }
 0x85c   : > { %v756_v18 = vrot.slane %v2542_v17, 2 }
 0x85e   : > { %757 = vrot.lane.b32.xlu1 %v756_v18, %s2261_s12 }
 0x8d0   : > { %v758_v19 = vpop.permute.xlu1 %757 }
 0x8d1   : > { %1841 = vmatmul.mubr.msk.f32.vlgmr.msra.gmra.mrb[4].mxu0 %vm402_vm5, %v758_v19 }
 0x8d2   : > { %1933 = vmatpush3.bf16.msra.mxu0 %v2465_v5  ;;  %1862 = vmatprep.mubr.msk.f32.mxu0 %vm2258_vm0, %v2259_v1 }
 0x8d3   : > { %1934 = vmatprep.subr.bf16.mxu0 %v2257_v0 }
 0x8d6   : > { %1936 = vmatpush3.bf16.msra.mxu0 %v2474_v10 }
 0x8d7   : > { %1943 = vmatprep.subr.bf16.mxu0 %v2257_v0 }
 0x9a4   : > { %v827_v20 = vpop.f32.mrb[4].mxu0 }
 0x9a5   : > { %v832_v21 = vrot.slane %v827_v20, 5  ;;  %v1842_v22 = vpop.f32.mrb[5].mxu0 }
 0x9a7   : > { %v834_v23 = vadd.f32 %v832_v21, %v2496_v14 }
 0x9a9   : > { %v1731_v25 = vmul.f32 -1.442695, %v834_v23 }
 0x9ab   : > { %2047 = vpow2.f32 %v1731_v25 }
 0x9ac   : > { %2049 = vtanh.f32 %v834_v23 }
 0x9b5   : > { %v2048_v26 = vpop.eup %2047 }
 0x9b6   : > { %v839_v27 = vadd.f32 1.0, %v2048_v26  ;;  %v2050_v28 = vpop.eup %2049 }
 0x9b8   : > { %2051 = vrcp.f32 %v839_v27 }
 0x9c2   : > { %v2052_v29 = vpop.eup %2051 }
 0x9c3   : > { %v842_v30 = vsel %vm2499_vm4, %v2050_v28, %v2052_v29 }
 0x9c4   : > { %848 = vrot.lane.b32.xlu0 %v842_v30, %s2260_s22  ;;  %v846_v34 = vmul.f32 %v844_v33, %v842_v30 }
 0xa36   : > { %v849_v31 = vpop.permute.xlu0 %848 }
 0xa37   : > { %v851_v32 = vmul.f32 %v849_v31, %v842_v30 }
 0xa39   : > { %853 = vrot.lane.b32.xlu1 %v851_v32, %s2261_s12 }
 0xaab   : > { %v854_v36 = vpop.permute.xlu1 %853 }
 0xaac   : > { %v856_v37 = vadd.f32 %v854_v36, %v846_v34 }
 0xaae   : > { %2053 = vtanh.f32 %v856_v37  ;;  %v962_v56 = vrot.slane %v856_v37, 7 }
 0xab8   : > { %v2054_v38 = vpop.eup %2053 }
 0xab9   : > { %859 = vrot.lane.b32.xlu0 %v2054_v38, %s2260_s22 }
 0xb2b   : > { %v860_v39 = vpop.permute.xlu0 %859 }
 0xb2c   : > { %v2559_v40 = vmul.f32 %v860_v39, %v842_v30 }
 0xb2e   : > { %v874_v41 = vrot.slane %v2559_v40, 3 }
 0xb30   : > { %875 = vrot.lane.b32.xlu1 %v874_v41, %s2261_s12 }
 0xba2   : > { %v876_v42 = vpop.permute.xlu1 %875 }
 0xba3   : > { %1852 = vmatmul.mubr.msk.f32.vlgmr.msra.gmra.mrb[4].mxu1 %vm402_vm5, %v876_v42 }
 0xba4   : > { %1939 = vmatpush3.bf16.msra.mxu1 %v2465_v5  ;;  %1873 = vmatprep.mubr.msk.f32.mxu1 %vm2258_vm0, %v2259_v1 }
 0xba5   : > { %1940 = vmatprep.subr.bf16.mxu1 %v2257_v0 }
 0xba8   : > { %1942 = vmatpush3.bf16.msra.mxu1 %v2474_v10 }
 0xba9   : > { %1949 = vmatprep.subr.bf16.mxu1 %v2257_v0 }
 0xc76   : > { %v945_v43 = vpop.f32.mrb[4].mxu1 }
 0xc77   : > { %v950_v44 = vrot.slane %v945_v43, 4  ;;  %v1853_v45 = vpop.f32.mrb[5].mxu1 }
 0xc79   : > { %v952_v46 = vadd.f32 %v950_v44, %v2496_v14 }
 0xc7b   : > { %v1733_v47 = vmul.f32 -1.442695, %v952_v46 }
 0xc7d   : > { %2055 = vpow2.f32 %v1733_v47 }
 0xc7e   : > { %2057 = vtanh.f32 %v952_v46 }
 0xc87   : > { %v2056_v48 = vpop.eup %2055 }
 0xc88   : > { %v957_v49 = vadd.f32 1.0, %v2056_v48  ;;  %v2058_v50 = vpop.eup %2057 }
 0xc8a   : > { %2059 = vrcp.f32 %v957_v49 }
 0xc94   : > { %v2060_v51 = vpop.eup %2059 }
 0xc95   : > { %v960_v52 = vsel %vm2499_vm4, %v2058_v50, %v2060_v51 }
 0xc96   : > { %966 = vrot.lane.b32.xlu0 %v960_v52, %s2260_s22  ;;  %v964_v57 = vmul.f32 %v962_v56, %v960_v52 }
 0xd08   : > { %v967_v53 = vpop.permute.xlu0 %966 }
 0xd09   : > { %v969_v54 = vmul.f32 %v967_v53, %v960_v52 }
 0xd0b   : > { %971 = vrot.lane.b32.xlu1 %v969_v54, %s2261_s12 }
 0xd7d   : > { %v972_v58 = vpop.permute.xlu1 %971 }
 0xd7e   : > { %v974_v59 = vadd.f32 %v972_v58, %v964_v57 }
 0xd80   : > { %2061 = vtanh.f32 %v974_v59  ;;  %v1080_v16 = vrot.slane %v974_v59, 7 }
 0xd8a   : > { %v2062_v60 = vpop.eup %2061 }
 0xd8b   : > { %977 = vrot.lane.b32.xlu0 %v2062_v60, %s2260_s22 }
 0xdfd   : > { %v978_v61 = vpop.permute.xlu0 %977 }
 0xdfe   : > { %v2576_v62 = vmul.f32 %v978_v61, %v960_v52 }
 0xe00   : > { %v992_v63 = vrot.slane %v2576_v62, 4 }
 0xe02   : > { %993 = vrot.lane.b32.xlu1 %v992_v63, %s2261_s12 }
 0xe74   : > { %v994_v2 = vpop.permute.xlu1 %993 }
 0xe75   : > { %1863 = vmatmul.mubr.msk.f32.vlgmr.msra.gmra.mrb[6].mxu0 %vm402_vm5, %v994_v2 }
 0xe76   : > { %1945 = vmatpush3.bf16.msra.mxu0 %v2465_v5  ;;  %1884 = vmatprep.mubr.msk.f32.mxu0 %vm2258_vm0, %v2259_v1 }
 0xe77   : > { %1946 = vmatprep.subr.bf16.mxu0 %v2257_v0 }
 0xe7a   : > { %1948 = vmatpush3.bf16.msra.mxu0 %v2474_v10 }
 0xf48   : > { %v1063_v3 = vpop.f32.mrb[6].mxu0 }
 0xf49   : > { %v1068_v4 = vrot.slane %v1063_v3, 3  ;;  %v1864_v6 = vpop.f32.mrb[7].mxu0 }
 0xf4b   : > { %v1070_v7 = vadd.f32 %v1068_v4, %v2496_v14 }
 0xf4d   : > { %v1735_v8 = vmul.f32 -1.442695, %v1070_v7 }
 0xf4f   : > { %2063 = vpow2.f32 %v1735_v8 }
 0xf50   : > { %2065 = vtanh.f32 %v1070_v7 }
 0xf59   : > { %v2064_v9 = vpop.eup %2063 }
 0xf5a   : > { %v1075_v11 = vadd.f32 1.0, %v2064_v9  ;;  %v2066_v12 = vpop.eup %2065 }
 0xf5c   : > { %2067 = vrcp.f32 %v1075_v11 }
 0xf66   : > { %v2068_v5 = vpop.eup %2067 }
 0xf67   : > { %v1078_v13 = vsel %vm2499_vm4, %v2066_v12, %v2068_v5 }
 0xf68   : > { %1084 = vrot.lane.b32.xlu0 %v1078_v13, %s2260_s22  ;;  %v1082_v18 = vmul.f32 %v1080_v16, %v1078_v13 }
 0xfda   : > { %v1085_v15 = vpop.permute.xlu0 %1084 }
 0xfdb   : > { %v1087_v10 = vmul.f32 %v1085_v15, %v1078_v13 }
 0xfdd   : > { %1089 = vrot.lane.b32.xlu1 %v1087_v10, %s2261_s12 }
0x104f   : > { %v1090_v19 = vpop.permute.xlu1 %1089 }
0x1050   : > { %v1092_v20 = vadd.f32 %v1090_v19, %v1082_v18 }
0x1052   : > { %2069 = vtanh.f32 %v1092_v20  ;;  %v1198_v39 = vrot.slane %v1092_v20, 7 }
0x105c   : > { %v2070_v21 = vpop.eup %2069 }
0x105d   : > { %1095 = vrot.lane.b32.xlu0 %v2070_v21, %s2260_s22 }
0x10cf   : > { %v1096_v22 = vpop.permute.xlu0 %1095 }
0x10d0   : > { %v2592_v23 = vmul.f32 %v1096_v22, %v1078_v13 }
0x10d2   : > { %v1110_v25 = vrot.slane %v2592_v23, 5 }
0x10d4   : > { %1111 = vrot.lane.b32.xlu1 %v1110_v25, %s2261_s12 }
0x1146   : > { %v1112_v26 = vpop.permute.xlu1 %1111 }
0x1147   : > { %1874 = vmatmul.mubr.msk.f32.vlgmr.msra.gmra.mrb[6].mxu1 %vm402_vm5, %v1112_v26 }
0x1148   : > { %1895 = vmatprep.mubr.msk.f32.mxu1 %vm2258_vm0, %v2259_v1 }
0x121a   : > { %v1181_v27 = vpop.f32.mrb[6].mxu1 }
0x121b   : > { %v1186_v28 = vrot.slane %v1181_v27, 2  ;;  %v1875_v29 = vpop.f32.mrb[7].mxu1 }
0x121d   : > { %v1188_v30 = vadd.f32 %v1186_v28, %v2496_v14 }
0x121f   : > { %v1737_v31 = vmul.f32 -1.442695, %v1188_v30 }
0x1221   : > { %2071 = vpow2.f32 %v1737_v31 }
0x1222   : > { %2073 = vtanh.f32 %v1188_v30 }
0x122b   : > { %v2072_v32 = vpop.eup %2071 }
0x122c   : > { %v1193_v33 = vadd.f32 1.0, %v2072_v32  ;;  %v2074_v34 = vpop.eup %2073 }
0x122e   : > { %2075 = vrcp.f32 %v1193_v33 }
0x1238   : > { %v2076_v36 = vpop.eup %2075 }
0x1239   : > { %v1196_v37 = vsel %vm2499_vm4, %v2074_v34, %v2076_v36 }
0x123a   : > { %1202 = vrot.lane.b32.xlu0 %v1196_v37, %s2260_s22  ;;  %v1200_v41 = vmul.f32 %v1198_v39, %v1196_v37 }
0x12ac   : > { %v1203_v38 = vpop.permute.xlu0 %1202 }
0x12ad   : > { %v1205_v1 = vmul.f32 %v1203_v38, %v1196_v37 }
0x12af   : > { %1207 = vrot.lane.b32.xlu1 %v1205_v1, %s2261_s12 }
0x1321   : > { %v1208_v42 = vpop.permute.xlu1 %1207 }
0x1322   : > { %v1210_v43 = vadd.f32 %v1208_v42, %v1200_v41 }
0x1324   : > { %2077 = vtanh.f32 %v1210_v43  ;;  %v1316_v63 = vrot.slane %v1210_v43, 7 }
0x132e   : > { %v2078_v44 = vpop.eup %2077 }
0x132f   : > { %1213 = vrot.lane.b32.xlu0 %v2078_v44, %s2260_s22 }
0x13a1   : > { %v1214_v45 = vpop.permute.xlu0 %1213 }
0x13a2   : > { %v2605_v46 = vmul.f32 %v1214_v45, %v1196_v37  ;;  %v2263_v45 = vmov 0  }
0x13a3   : > { %2022 = vset.pattern.permute.xlu0 %v2263_v45  ;;  %2021 = vset.pattern.permute.xlu1 %v2263_v45 }
0x13a4   : > { %v1228_v47 = vrot.slane %v2605_v46, 6 }
0x13a6   : > { %1229 = vrot.lane.b32.xlu1 %v1228_v47, %s2261_s12 }
0x1418   : > { %v1230_v48 = vpop.permute.xlu1 %1229 }
0x1419   : > { %1885 = vmatmul.mubr.msk.f32.vlgmr.msra.gmra.mrb[8].mxu0 %vm402_vm5, %v1230_v48 }
0x14ec   : > { %v1299_v49 = vpop.f32.mrb[8].mxu0 }
0x14ed   : > { %v1304_v50 = vrot.slane %v1299_v49, 1  ;;  %v1886_v51 = vpop.f32.mrb[9].mxu0 }
0x14ef   : > { %v1306_v52 = vadd.f32 %v1304_v50, %v2496_v14  ;;  %v1725_v14 = vld [vmem:[%s2716_s4] ss:$0 sm:$0xff] }
0x14f1   : > { %v1739_v53 = vmul.f32 -1.442695, %v1306_v52 }
0x14f3   : > { %2079 = vpow2.f32 %v1739_v53 }
0x14f4   : > { %2081 = vtanh.f32 %v1306_v52 }
0x14fd   : > { %v2080_v54 = vpop.eup %2079 }
0x14fe   : > { %v1311_v56 = vadd.f32 1.0, %v2080_v54  ;;  %v2082_v57 = vpop.eup %2081 }
0x1500   : > { %2083 = vrcp.f32 %v1311_v56 }
0x1501   : > { %2085 = vtanh.f32 %v2508_v35 }
0x1502   : > { %2087 = vtanh.f32 %v2559_v40 }
0x1503   : > { %2089 = vtanh.f32 %v2592_v23 }
0x150a   : > { %v2084_v58 = vpop.eup %2083 }
0x150b   : > { %v1314_v59 = vsel %vm2499_vm4, %v2082_v57, %v2084_v58  ;;  %v2086_v4 = vpop.eup %2085 }
0x150c   : > { %1320 = vrot.lane.b32.xlu0 %v1314_v59, %s2260_s22  ;;  %v1318_v2 = vmul.f32 %v1316_v63, %v1314_v59  ;;  %v2088_v8 = vpop.eup %2087 }
0x150d   : > { %v2090_v11 = vpop.eup %2089 }
0x157e   : > { %v1321_v60 = vpop.permute.xlu0 %1320 }
0x157f   : > { %v1323_v61 = vmul.f32 %v1321_v60, %v1314_v59 }
0x1581   : > { %1325 = vrot.lane.b32.xlu1 %v1323_v61, %s2261_s12 }
0x1585   : > { %508 = vrot.lane.b32.xlu1 %v1725_v14, %s2262_s9  ;;  %s307_s9 = scalar_lea.vmem [#allocation7], %s2441_s10 }
0x1586   : > { %s1637_s16 = sshll.u32 %s307_s9, 4  ;;  %s2670_s16 = int_to_ptr.vmem [resolvable:$true] %s1637_s16 }
0x1587   : > { %s2181_s20 = scalar_lea.vmem %s2670_s16, 16  ;;  %p2188_p10 = scmp.lt.s32.totalorder %s2670_s16, %s2186_s11 }
0x1588   : > { %p2182_p4 = scmp.ne.s32.totalorder %s2670_s16, %s2181_s20  ;;  %p2189_p13 = scmp.lt.s32.totalorder %s2187_s17, %s2181_s20 }
0x158a   : > { %p2183_p6 = pnand %p2182_p4, %p2396_p12  ;;  %p2190_p3 = por %p2189_p13, %p2188_p10 }
0x158c   : > { %p2184_p8 = pneg %p2183_p6 }
0x158e   : > { %p2191_p7 = pnand %p2190_p3, %p2184_p8 }
0x15f3   : > { %v1326_v24 = vpop.permute.xlu1 %1325 }
0x15f4   : > { %v1328_v3 = vadd.f32 %v1326_v24, %v1318_v2 }
0x15f6   : > { %2091 = vtanh.f32 %v1328_v3 }
0x15f7   : > { %v509_v6 = vpop.permute.xlu1 %508  ;;  %2093 = vtanh.f32 %v2525_v55 }
0x15f8   : > { %v511_v7 = vmul.f32 %v2086_v4, %v509_v6  ;;  %2095 = vtanh.f32 %v2542_v17  ;;  %v864_v9 = vmul.f32 %v2088_v8, %v509_v6  ;;  %v1100_v5 = vmul.f32 %v2090_v11, %v509_v6 }
0x15f9   : > { %2097 = vtanh.f32 %v2576_v62 }
0x15fa   : > { %513 = vrot.lane.b32.xlu1 %v511_v7, %s2261_s12  ;;  %2099 = vtanh.f32 %v2605_v46 }
0x15fe   : > { %866 = vrot.lane.b32.xlu1 %v864_v9, %s2261_s12 }
0x1600   : > { %v2092_v12 = vpop.eup %2091 }
0x1601   : > { %1331 = vrot.lane.b32.xlu0 %v2092_v12, %s2260_s22  ;;  %v2094_v13 = vpop.eup %2093 }
0x1602   : > { %1102 = vrot.lane.b32.xlu1 %v1100_v5, %s2261_s12  ;;  %v628_v15 = vmul.f32 %v2094_v13, %v509_v6  ;;  %v2096_v10 = vpop.eup %2095 }
0x1603   : > { %v746_v16 = vmul.f32 %v2096_v10, %v509_v6  ;;  %v2098_v18 = vpop.eup %2097 }
0x1604   : > { %v982_v19 = vmul.f32 %v2098_v18, %v509_v6  ;;  %v2100_v20 = vpop.eup %2099 }
0x1605   : > { %630 = vrot.lane.b32.xlu0 %v628_v15, %s2261_s12  ;;  %v1218_v21 = vmul.f32 %v2100_v20, %v509_v6 }
0x1609   : > { %748 = vrot.lane.b32.xlu0 %v746_v16, %s2261_s12 }
0x160d   : > { %984 = vrot.lane.b32.xlu0 %v982_v19, %s2261_s12 }
0x1611   : > { %1220 = vrot.lane.b32.xlu0 %v1218_v21, %s2261_s12 }
0x166c   : > { %v514_v26 = vpop.permute.xlu1 %513 }
0x166d   : > { %v517_v1 = vsel %vm516_vm10, %v514_v26, 0.0 }
0x1670   : > { %v867_v29 = vpop.permute.xlu1 %866 }
0x1671   : > { %v870_v33 = vsel %vm869_vm8, %v867_v29, 0.0 }
0x1673   : > { %v1332_v22 = vpop.permute.xlu0 %1331 }
0x1674   : > { %v2633_v25 = vmul.f32 %v1332_v22, %v1314_v59  ;;  %v1103_v34 = vpop.permute.xlu1 %1102 }
0x1675   : > { %v1106_v37 = vsel %vm1105_vm9, %v1103_v34, 0.0 }
0x1676   : > { %2101 = vtanh.f32 %v2633_v25 }
0x1677   : > { %v631_v27 = vpop.permute.xlu0 %630 }
0x1678   : > { %v634_v28 = vsel %vm633_vm6, %v631_v27, 0.0 }
0x1679   : > { %635 = vadd.xlane.f32.xlu0 %v634_v28 }
0x167b   : > { %v749_v30 = vpop.permute.xlu0 %748 }
0x167c   : > { %v752_v31 = vsel %vm751_vm7, %v749_v30, 0.0 }
0x167d   : > { %753 = vadd.xlane.f32.xlu0 %v752_v31 }
0x167f   : > { %v985_v38 = vpop.permute.xlu0 %984 }
0x1680   : > { %v2102_v32 = vpop.eup %2101  ;;  %v988_v39 = vsel %vm987_vm11, %v985_v38, 0.0 }
0x1681   : > { %871 = vadd.xlane.f32.xlu0 %v870_v33  ;;  %v1336_v36 = vmul.f32 %v2102_v32, %v509_v6 }
0x1683   : > { %1338 = vrot.lane.b32.xlu1 %v1336_v36, %s2261_s12  ;;  %v1221_v41 = vpop.permute.xlu0 %1220 }
0x1684   : > { %v1224_v42 = vsel %vm1223_vm12, %v1221_v41, 0.0 }
0x1685   : > { %1107 = vadd.xlane.f32.xlu0 %v1106_v37 }
0x16a7   : > { %518 = vadd.xlane.f32.xlu1 %v517_v1 }
0x16ab   : > { %989 = vadd.xlane.f32.xlu1 %v988_v39 }
0x16af   : > { %1225 = vadd.xlane.f32.xlu1 %v1224_v42 }
0x16f5   : > { %v1339_v43 = vpop.permute.xlu1 %1338 }
0x16f6   : > { %v1342_v44 = vsel %vm1341_vm13, %v1339_v43, 0.0 }
0x16f7   : > { %1343 = vadd.xlane.f32.xlu0 %v1342_v44 }
0x1706   : > { %v636_v47 = vpop.xlane.xlu0 %635 }
0x1707   : > { %v1346_v50 = vrot.slane %v636_v47, 1 }
0x170a   : > { %v754_v48 = vpop.xlane.xlu0 %753 }
0x170b   : > { %v1350_v52 = vrot.slane %v754_v48, 2 }
0x170e   : > { %v872_v53 = vpop.xlane.xlu0 %871 }
0x170f   : > { %v1354_v57 = vrot.slane %v872_v53, 3 }
0x1712   : > { %v1108_v60 = vpop.xlane.xlu0 %1107 }
0x1713   : > { %v1362_v63 = vrot.slane %v1108_v60, 5 }
0x1734   : > { %v519_v49 = vpop.xlane.xlu1 %518 }
0x1735   : > { %v1348_v51 = vmax.f32 %v519_v49, %v1346_v50 }
0x1737   : > { %v1352_v54 = vmax.f32 %v1348_v51, %v1350_v52 }
0x1738   : > { %v990_v56 = vpop.xlane.xlu1 %989 }
0x1739   : > { %v1356_v58 = vmax.f32 %v1352_v54, %v1354_v57  ;;  %v1358_v59 = vrot.slane %v990_v56, 4 }
0x173b   : > { %v1360_v61 = vmax.f32 %v1356_v58, %v1358_v59 }
0x173c   : > { %v1226_v14 = vpop.xlane.xlu1 %1225 }
0x173d   : > { %v1364_v2 = vmax.f32 %v1360_v61, %v1362_v63  ;;  %v1366_v24 = vrot.slane %v1226_v14, 6 }
0x173f   : > { %v1368_v4 = vmax.f32 %v1364_v2, %v1366_v24 }
0x1784   : > { %v1344_v3 = vpop.xlane.xlu0 %1343 }
0x1785   : > { %v1370_v6 = vrot.slane %v1344_v3, 7 }
0x1787   : > { %v1372_v7 = vmax.f32 %v1368_v4, %v1370_v6 }
0x1789   : > { %v1377_v8 = vrot.slane %v1372_v7, 7  ;;  %v1382_v9 = vrot.slane %v1372_v7, 6  ;;  %v1387_v11 = vrot.slane %v1372_v7, 5  ;;  %v1392_v12 = vrot.slane %v1372_v7, 4 }
0x178a   : > { %v1397_v5 = vrot.slane %v1372_v7, 3  ;;  %v1402_v13 = vrot.slane %v1372_v7, 2  ;;  %v1373_v15 = vsub.f32 %v519_v49, %v1372_v7  ;;  %v1407_v20 = vrot.slane %v1372_v7, 1 }
0x178b   : > { %v1379_v10 = vsub.f32 %v636_v47, %v1377_v8  ;;  %v1384_v16 = vsub.f32 %v754_v48, %v1382_v9  ;;  %v1389_v18 = vsub.f32 %v872_v53, %v1387_v11  ;;  %v1394_v19 = vsub.f32 %v990_v56, %v1392_v12 }
0x178c   : > { %v1374_v21 = vmul.f32 1.442695, %v1373_v15  ;;  %v1399_v28 = vsub.f32 %v1108_v60, %v1397_v5  ;;  %v1404_v30 = vsub.f32 %v1226_v14, %v1402_v13  ;;  %v1409_v32 = vsub.f32 %v1344_v3, %v1407_v20  ;;  %v1541_v15 = vld [vmem:[%s2717_s5] sm:$0xff] }
0x178d   : > { %v1380_v22 = vmul.f32 1.442695, %v1379_v10  ;;  %v1385_v26 = vmul.f32 1.442695, %v1384_v16  ;;  %v1390_v27 = vmul.f32 1.442695, %v1389_v18 }
0x178e   : > { %2103 = vpow2.f32 %v1374_v21  ;;  %v1395_v29 = vmul.f32 1.442695, %v1394_v19  ;;  %v1400_v31 = vmul.f32 1.442695, %v1399_v28  ;;  %v1405_v33 = vmul.f32 1.442695, %v1404_v30 }
0x178f   : > { %2105 = vpow2.f32 %v1380_v22  ;;  %v1410_v34 = vmul.f32 1.442695, %v1409_v32  ;;  %v1542_v10 = vld [vmem:[%s2717_s5 + $0x8] sm:$0xff]  ;;  %v1543_v16 = vld [vmem:[%s2717_s5 + $0x10] sm:$0xff]  ;;  %v1544_v19 = vld [vmem:[%s2717_s5 + $0x18] sm:$0xff] }
0x1790   : > { %2107 = vpow2.f32 %v1385_v26  ;;  %v1950_v18 = vpack.c.bf16 %v1542_v10, %v1541_v15  ;;  %v1953_v20 = vpack.c.bf16 %v1544_v19, %v1543_v16 }
0x1791   : > { %2109 = vpow2.f32 %v1390_v27 }
0x1792   : > { %2111 = vpow2.f32 %v1395_v29  ;;  %1951 = vmatpush3.bf16.msra.mxu1 %v1950_v18 }
0x1793   : > { %2113 = vpow2.f32 %v1400_v31  ;;  %1952 = vmatprep.subr.bf16.mxu1 %v2257_v0 }
0x1794   : > { %2115 = vpow2.f32 %v1405_v33 }
0x1795   : > { %2117 = vpow2.f32 %v1410_v34 }
0x1796   : > { %1954 = vmatpush3.bf16.msra.mxu1 %v1953_v20 }
0x1798   : > { %v2104_v36 = vpop.eup %2103 }
0x1799   : > { %v2106_v37 = vpop.eup %2105 }
0x179a   : > { %v2108_v38 = vpop.eup %2107  ;;  %v1413_v1 = vrot.slane %v2106_v37, 1 }
0x179b   : > { %v2110_v39 = vpop.eup %2109  ;;  %v1417_v42 = vrot.slane %v2108_v38, 2 }
0x179c   : > { %v1415_v41 = vadd.f32 %v2104_v36, %v1413_v1  ;;  %v2112_v43 = vpop.eup %2111  ;;  %v1421_v45 = vrot.slane %v2110_v39, 3 }
0x179d   : > { %v2114_v47 = vpop.eup %2113  ;;  %v1425_v49 = vrot.slane %v2112_v43, 4 }
0x179e   : > { %v1419_v44 = vadd.f32 %v1417_v42, %v1415_v41  ;;  %v2116_v50 = vpop.eup %2115  ;;  %v1429_v52 = vrot.slane %v2114_v47, 5 }
0x179f   : > { %v2118_v53 = vpop.eup %2117  ;;  %v1433_v56 = vrot.slane %v2116_v50, 6 }
0x17a0   : > { %v1423_v48 = vadd.f32 %v1421_v45, %v1419_v44  ;;  %v1437_v57 = vrot.slane %v2118_v53, 7 }
0x17a2   : > { %v1427_v51 = vadd.f32 %v1425_v49, %v1423_v48 }
0x17a4   : > { %v1431_v54 = vadd.f32 %v1429_v52, %v1427_v51 }
0x17a6   : > { %v1435_v58 = vadd.f32 %v1433_v56, %v1431_v54 }
0x17a8   : > { %v1439_v59 = vadd.f32 %v1437_v57, %v1435_v58 }
0x17aa   : > { %2119 = vrcp.f32 %v1439_v59 }
0x17b4   : > { %v2120_v60 = vpop.eup %2119 }
0x17b5   : > { %v1442_v61 = vmul.f32 %v2120_v60, %v2104_v36  ;;  %v1450_v14 = vrot.slane %v2120_v60, 7  ;;  %v1463_v2 = vrot.slane %v2120_v60, 6  ;;  %v1476_v3 = vrot.slane %v2120_v60, 5 }
0x17b6   : > { %v1489_v6 = vrot.slane %v2120_v60, 4  ;;  %v1502_v8 = vrot.slane %v2120_v60, 3  ;;  %v1515_v11 = vrot.slane %v2120_v60, 2  ;;  %v1528_v5 = vrot.slane %v2120_v60, 1 }
0x17b7   : > { %1445 = vperm.xlu0 %2022, %v1442_v61   ;;  %v1452_v63 = vmul.f32 %v2106_v37, %v1450_v14  ;;  %v1465_v24 = vmul.f32 %v2108_v38, %v1463_v2  ;;  %v1478_v4 = vmul.f32 %v2110_v39, %v1476_v3 }
0x17b8   : > { %v1491_v7 = vmul.f32 %v2112_v43, %v1489_v6  ;;  %v1504_v9 = vmul.f32 %v2114_v47, %v1502_v8  ;;  %v1517_v12 = vmul.f32 %v2116_v50, %v1515_v11  ;;  %v1530_v13 = vmul.f32 %v2118_v53, %v1528_v5 }
0x17b9   : > { %1455 = vperm.xlu1 %2021, %v1452_v63  }
0x17bd   : > { %1468 = vperm.xlu1 %2021, %v1465_v24  }
0x17c1   : > { %1481 = vperm.xlu1 %2021, %v1478_v4  }
0x17c5   : > { %1494 = vperm.xlu1 %2021, %v1491_v7  }
0x17c9   : > { %1507 = vperm.xlu1 %2021, %v1504_v9  }
0x17cd   : > { %1520 = vperm.xlu1 %2021, %v1517_v12  }
0x17d1   : > { %1533 = vperm.xlu1 %2021, %v1530_v13  }
0x1836   : > { %v1446_v29 = vpop.permute.xlu0 %1445 }
0x1837   : > { %v1448_v33 = vmul.f32 %v1446_v29, %v2508_v35 }
0x1838   : > { %v1456_v21 = vpop.permute.xlu1 %1455 }
0x1839   : > { %v1458_v27 = vmul.f32 %v1456_v21, %v2525_v55 }
0x183b   : > { %v1460_v31 = vrot.slane %v1458_v27, 1 }
0x183c   : > { %v1469_v22 = vpop.permute.xlu1 %1468 }
0x183d   : > { %v1471_v28 = vmul.f32 %v1469_v22, %v2542_v17  ;;  %v1462_v0 = vadd.f32 %v1460_v31, %v1448_v33 }
0x183f   : > { %v1473_v34 = vrot.slane %v1471_v28, 2 }
0x1840   : > { %v1482_v26 = vpop.permute.xlu1 %1481 }
0x1841   : > { %v1484_v32 = vmul.f32 %v1482_v26, %v2559_v40  ;;  %v1475_v39 = vadd.f32 %v1473_v34, %v1462_v0 }
0x1843   : > { %v1486_v38 = vrot.slane %v1484_v32, 3 }
0x1844   : > { %v1495_v30 = vpop.permute.xlu1 %1494 }
0x1845   : > { %v1497_v36 = vmul.f32 %v1495_v30, %v2576_v62  ;;  %v1488_v42 = vadd.f32 %v1486_v38, %v1475_v39 }
0x1847   : > { %v1499_v41 = vrot.slane %v1497_v36, 4 }
0x1848   : > { %v1508_v37 = vpop.permute.xlu1 %1507 }
0x1849   : > { %v1510_v1 = vmul.f32 %v1508_v37, %v2592_v23  ;;  %v1501_v40 = vadd.f32 %v1499_v41, %v1488_v42 }
0x184b   : > { %v1512_v17 = vrot.slane %v1510_v1, 5 }
0x184c   : > { %v1521_v55 = vpop.permute.xlu1 %1520 }
0x184d   : > { %v1523_v43 = vmul.f32 %v1521_v55, %v2605_v46  ;;  %v1514_v45 = vadd.f32 %v1512_v17, %v1501_v40  ;;  %v1545_v46 = vld [vmem:[%s2718_s6] sm:$0x1] }
0x184f   : > { %v1525_v44 = vrot.slane %v1523_v43, 6 }
0x1850   : > { %v1534_v35 = vpop.permute.xlu1 %1533 }
0x1851   : > { %v1536_v62 = vmul.f32 %v1534_v35, %v2633_v25  ;;  %v1527_v47 = vadd.f32 %v1525_v44, %v1514_v45 }
0x1853   : > { %v1538_v48 = vrot.slane %v1536_v62, 7 }
0x1855   : > { %v1540_v49 = vadd.f32 %v1538_v48, %v1527_v47 }
0x1857   : > { %2121 = vtanh.f32 %v1540_v49 }
0x1861   : > { %v2122_v23 = vpop.eup %2121 }
0x1862   : > { %1548 = vrot.lane.b32.xlu1 %v2122_v23, %s2261_s12  ;;  %s1625_s12 = scalar_lea.sflag [#allocation4], %s2441_s10 }
0x18d4   : > { %v1549_v50 = vpop.permute.xlu1 %1548 }
0x18d5   : > { %1896 = vmatmul.mubr.msk.f32.vlgmr.msra.gmra.mrb[8].mxu1 %vm402_vm5, %v1549_v50 }
0x19a8   : > { %v1618_v25 = vpop.f32.mrb[8].mxu1 }
0x19a9   : > { %v1619_v51 = vadd.f32 %v1618_v25, %v1545_v46  ;;  %v1897_v52 = vpop.f32.mrb[9].mxu1 }
0x19ab   : > { %1623 = vst.msk [vmem:[%s307_s9] sm:$0x1] %vm1622_vm14, %v1619_v51 }
0x19ac   : > { %2194 = shalt.err (!%p2191_p7)
}
0x19ad   : > { %s2195_s10 = scalar_lea.hbm %s2668_s29, 16  ;;  %s2199_s23 = scalar_lea.hbm %s2719_s7, 32 }
0x19ae   : > { %p2196_p9 = scmp.ne.s32.totalorder %s2668_s29, %s2195_s10  ;;  %p2200_p0 = scmp.lt.u32.totalorder %s2668_s29, %s2719_s7 }
0x19af   : > { %p2201_p1 = scmp.lt.u32.totalorder %s2199_s23, %s2195_s10  ;;  %p2203_p4 = scmp.lt.u32.totalorder %s2195_s10, %s2668_s29 }
0x19b0   : > { %p2197_p2 = pnand %p2196_p9, %p2396_p12 }
0x19b1   : > { %p2202_p11 = por %p2201_p1, %p2200_p0 }
0x19b2   : > { %p2198_p5 = pneg %p2197_p2 }
0x19b3   : > { %p2204_p6 = por %p2203_p4, %p2202_p11 }
0x19b5   : > { %p2205_p8 = pnand %p2204_p6, %p2198_p5 }
0x19b7   : > { %2208 = shalt.err (!%p2205_p8)
}
0x19b8   : > { %1961 = dma.vmem_to_hbm [thread:$0]  (%p2396_p12), %s2670_s16, 16, %s2668_s29, %s1625_s12  }
0x19b9 PF: > { %s1649_s14 = sand.u32 1, %s2239_s24   ;;  %p2736_p10 = scmp.ne.s32.totalorder %s2724_s8, 0 }
0x19ba   : > { %p2737_p13 = scmp.ge.s32.totalorder %s2251_s27, 2  ;;  %s1650_s15 = scalar_lea.sflag [#allocation4], %s1649_s14 }
0x19bc   : > { %p1972_p3 = pnand %p2737_p13, %p2736_p10 }
0x19be   : > { %2234 = dma.done.wait (!%p1972_p3), %s1650_s15, 16  }
0x19bf   : > { %2236 = vsyncadd (!%p1972_p3), %s1650_s15, 4294967280  ;;  %p21_p7 = scmp.ge.s32.totalorder %s2361_s13, 4   ;;  %s2738_s24 = smov %s2243_s25 }
0x19c0   : > { %s2739_s25 = smov %s2247_s26  ;;  %s2740_s26 = smov %s2392_s18 }
0x19c1   : > { %s2741_s27 = smov %s2361_s13  ;;  %23 = sbr.rel (!%p21_p7) target bundleno = 6 (0x6), region = 97 }
0x19c8   :  { %1654 = vsyncpa [#allocation3], 1 }
0x19c9   :  { %1656 = vsyncpa [#allocation3 + $0x1], 1 }
0x19ca   :  { %1657 = vsyncpa [#allocation6], 1 }
0x19cb   :  { %1658 = vsyncpa [#allocation4], 1 }
0x19cc   :  { %1660 = vsyncpa [#allocation4 + $0x1], 1 }

</bundles_post_ra>
